<compile_context>
chip_gen: v5e
topology: v5e:2x2
jax: 0.10.0
libtpu: 0.0.40
codegen_flags: <defaults>
</compile_context>

<pallas_src>
import functools
import math

import jax
import jax.numpy as jnp
from jax import lax
from jax.experimental import pallas as pl
from jax.experimental.pallas import tpu as pltpu

_VMEM_LIMIT = 32 * 1024 * 1024  # safe on v5e/v6e/v7x at these block sizes


def _n_bits(n):
    return max(1, (n - 1).bit_length())


# ---------------------------------------------------------------------------
# Kernel 1: fused  q-projection + k-projection + circular-correlation mean
# ---------------------------------------------------------------------------
def _qk_corr_kernel(q_in_ref, k_in_ref, wq_ref, bq_ref, wk_ref, bk_ref,
                    corr_ref, *, L, S, n_bits, inv_chan):
    bf16 = jnp.bfloat16
    # Projections: bf16 MXU operands (cast in-register), f32 accumulation.
    qp = jnp.dot(q_in_ref[...].astype(bf16), wq_ref[...].astype(bf16),
                 preferred_element_type=jnp.float32) + bq_ref[...]
    kp = jnp.dot(k_in_ref[...].astype(bf16), wk_ref[...].astype(bf16),
                 preferred_element_type=jnp.float32) + bk_ref[...]

    # Length alignment exactly as AutoCorrelation.forward (after projection).
    if L > S:
        kp = jnp.concatenate(
            [kp, jnp.zeros((L - S, kp.shape[1]), jnp.float32)], axis=0)
    elif L < S:
        kp = kp[:L]

    # g[t, a] = <k[t, :], q[a, :]> contracted over the H*E channel axis (MXU).
    g = lax.dot_general(kp.astype(bf16), qp.astype(bf16),
                        dimension_numbers=(((1,), (1,)), ((), ())),
                        preferred_element_type=jnp.float32)

    # Wrapped-diagonal sum: y[t, j] = g[t, (j + t) % L] via ceil(log2 L) static
    # XLU lane-rolls.  pltpu.roll(x, L - a, axis=1) == left-roll by a.
    # Mask built from an (L, 1) iota and broadcast by jnp.where (low vreg cost).
    row = lax.broadcasted_iota(jnp.int32, (L, 1), 0)
    for bit in range(n_bits):
        amt = 1 << bit
        g = jnp.where((row & amt) != 0, pltpu.roll(g, L - amt, axis=1), g)

    # corr[tau] = (1/(H*E)) * sum_t sum_c q[(t+tau)%L, c] * k[t, c]
    #           == mean over heads/channels of irfft(rfft(q) * conj(rfft(k)))
    corr_ref[...] = (jnp.sum(g, axis=0, keepdims=True) * inv_chan
                     ).astype(corr_ref.dtype)


# ---------------------------------------------------------------------------
# Kernel 2: fused  v-projection + time-delay aggregation + output projection
# ---------------------------------------------------------------------------
def _v_agg_out_kernel(w_ref, idx_ref, v_in_ref, wv_ref, bv_ref, wo_ref, bo_ref,
                      o_ref, v2_ref, *, L, S, top_k):
    bf16 = jnp.bfloat16
    b = pl.program_id(0)
    # Hoist all scalar (SMEM) reads ahead of the vector work.
    delays = [idx_ref[i] for i in range(top_k)]
    wgts = [w_ref[b, i] for i in range(top_k)]

    # Value projection (bf16 MXU operands, f32 accumulation).
    vp = jnp.dot(v_in_ref[...].astype(bf16), wv_ref[...].astype(bf16),
                 preferred_element_type=jnp.float32) + bv_ref[...]
    HD = vp.shape[1]

    # Write the (length-aligned) values twice into a [2L, HD] VMEM scratch so
    # every circular shift becomes a contiguous dynamic slice.
    if L > S:
        pad = jnp.zeros((L - S, HD), jnp.float32)
        v2_ref[pl.ds(0, S), :] = vp
        v2_ref[pl.ds(S, L - S), :] = pad
        v2_ref[pl.ds(L, S), :] = vp
        v2_ref[pl.ds(L + S, L - S), :] = pad
    else:
        vL = vp if L == S else vp[:L]
        v2_ref[pl.ds(0, L), :] = vL
        v2_ref[pl.ds(L, L), :] = vL

    # delays_agg[l, c] = sum_i w_i * v[(l + delay_i) % L, c]
    acc = wgts[0] * v2_ref[pl.ds(delays[0], L), :]
    for i in range(1, top_k):
        acc = acc + wgts[i] * v2_ref[pl.ds(delays[i], L), :]

    # Fused output projection.
    o_ref[...] = (jnp.dot(acc.astype(bf16), wo_ref[...].astype(bf16),
                          preferred_element_type=jnp.float32)
                  + bo_ref[...]).astype(o_ref.dtype)


# ------------------------------ full forward ----------------------------------
def auto_correlation_layer_forward(params, queries, keys, values, *,
                                   n_heads, factor=1):
    """AutoCorrelationLayer.forward with the training-mode time_delay_agg branch
    of AutoCorrelation (output_attention=False -> attn is None)."""
    del n_heads  # head split/merge is a pure reshape; the math is head-agnostic
    B, L, dm = queries.shape
    _, S, _ = keys.shape
    HE = params["wq_t"].shape[1]   # d_keys   * n_heads
    HD = params["wv_t"].shape[1]   # d_values * n_heads

    # ---- stage 1: q/k projection + correlation mean (one call, grid over B) ----
    corr = pl.pallas_call(
        functools.partial(_qk_corr_kernel, L=L, S=S,
                          n_bits=_n_bits(L), inv_chan=1.0 / HE),
        out_shape=jax.ShapeDtypeStruct((B, 1, L), jnp.float32),
        grid=(B,),
        in_specs=[
            pl.BlockSpec((None, L, dm), lambda b: (b, 0, 0)),
            pl.BlockSpec((None, S, dm), lambda b: (b, 0, 0)),
            pl.BlockSpec((dm, HE), lambda b: (0, 0)),
            pl.BlockSpec((1, HE), lambda b: (0, 0)),
            pl.BlockSpec((dm, HE), lambda b: (0, 0)),
            pl.BlockSpec((1, HE), lambda b: (0, 0)),
        ],
        out_specs=pl.BlockSpec((None, 1, L), lambda b: (b, 0, 0)),
        compiler_params=pltpu.CompilerParams(
            dimension_semantics=("parallel",),
            vmem_limit_bytes=_VMEM_LIMIT),
    )(queries, keys,
      params["wq_t"], params["bq"].reshape(1, HE),
      params["wk_t"], params["bk"].reshape(1, HE))
    mean_value = corr[:, 0, :]                                  # [B, L]

    # ---- training-mode top-k delay selection (tiny scalar glue, fused by jit) ----
    top_k = max(1, int(factor * math.log(L)))
    _, index = lax.top_k(jnp.mean(mean_value, axis=0), top_k)  # [top_k]
    weights = jnp.take(mean_value, index, axis=1)               # [B, top_k]
    tmp_corr = jax.nn.softmax(weights, axis=-1)

    # ---- stage 2: v projection + aggregation + out projection (one call) ----
    out = pl.pallas_call(
        functools.partial(_v_agg_out_kernel, L=L, S=S, top_k=top_k),
        out_shape=jax.ShapeDtypeStruct((B, L, dm), jnp.float32),
        grid=(B,),
        in_specs=[
            pl.BlockSpec(memory_space=pltpu.MemorySpace.SMEM),   # weights [B,k]
            pl.BlockSpec(memory_space=pltpu.MemorySpace.SMEM),   # delays  [k]
            pl.BlockSpec((None, S, dm), lambda b: (b, 0, 0)),
            pl.BlockSpec((dm, HD), lambda b: (0, 0)),
            pl.BlockSpec((1, HD), lambda b: (0, 0)),
            pl.BlockSpec((HD, dm), lambda b: (0, 0)),
            pl.BlockSpec((1, dm), lambda b: (0, 0)),
        ],
        out_specs=pl.BlockSpec((None, L, dm), lambda b: (b, 0, 0)),
        scratch_shapes=[pltpu.VMEM((2 * L, HD), jnp.float32)],
        compiler_params=pltpu.CompilerParams(
            dimension_semantics=("parallel",),
            vmem_limit_bytes=_VMEM_LIMIT),
    )(tmp_corr.astype(jnp.float32), index.astype(jnp.int32), values,
      params["wv_t"], params["bv"].reshape(1, HD),
      params["wo_t"], params["bo"].reshape(1, dm))

    return out, None   # inner AutoCorrelation built with output_attention=False


# --------------------------- pure-JAX FFT reference ----------------------------
def _reference_forward(params, queries, keys, values, *, factor=1):
    """Mirrors the kernel's bf16 operand rounding but computes the correlation
    with jnp.fft (the exact AutoCorrelation formulation) — validates the
    pltpu.roll sign convention and the aggregation."""
    r = lambda x: x.astype(jnp.bfloat16).astype(jnp.float32)
    hp = lax.Precision.HIGHEST
    B, L, dm = queries.shape
    _, S, _ = keys.shape
    q = jnp.einsum("bld,de->ble", r(queries), r(params["wq_t"]), precision=hp) + params["bq"]
    k = jnp.einsum("bsd,de->bse", r(keys), r(params["wk_t"]), precision=hp) + params["bk"]
    v = jnp.einsum("bsd,de->bse", r(values), r(params["wv_t"]), precision=hp) + params["bv"]
    if L > S:
        k = jnp.concatenate([k, jnp.zeros((B, L - S, k.shape[-1]), k.dtype)], axis=1)
        v = jnp.concatenate([v, jnp.zeros((B, L - S, v.shape[-1]), v.dtype)], axis=1)
    else:
        k, v = k[:, :L], v[:, :L]
    qf = jnp.fft.rfft(r(q), axis=1)
    kf = jnp.fft.rfft(r(k), axis=1)
    corr = jnp.fft.irfft(qf * jnp.conj(kf), n=L, axis=1)        # [B, L, H*E]
    mean_value = jnp.mean(corr, axis=-1)                        # [B, L]
    top_k = max(1, int(factor * math.log(L)))
    _, index = lax.top_k(jnp.mean(mean_value, axis=0), top_k)
    weights = jnp.take(mean_value, index, axis=1)
    tmp_corr = jax.nn.softmax(weights, axis=-1)
    agg = jnp.zeros_like(v)
    for i in range(top_k):
        agg = agg + jnp.roll(v, -index[i], axis=1) * tmp_corr[:, i][:, None, None]
    return jnp.einsum("ble,ed->bld", r(agg), r(params["wo_t"]), precision=hp) + params["bo"]


# ------------------------------ parameter init --------------------------------
def init_linear(key, d_in, d_out):
    kw, kb = jax.random.split(key)
    bound = 1.0 / math.sqrt(d_in)
    w_t = jax.random.uniform(kw, (d_in, d_out), jnp.float32, -bound, bound)
    b = jax.random.uniform(kb, (d_out,), jnp.float32, -bound, bound)
    return w_t, b


if __name__ == "__main__":
    B, L, S = 2, 128, 128          # L = 128 keeps the lag axis lane-dense
    d_model, n_heads = 32, 4
    d_k = d_model // n_heads       # d_keys == d_values == 8

    key = jax.random.PRNGKey(0)
    ks = jax.random.split(key, 7)

    params = {}
    params["wq_t"], params["bq"] = init_linear(ks[0], d_model, d_k * n_heads)
    params["wk_t"], params["bk"] = init_linear(ks[1], d_model, d_k * n_heads)
    params["wv_t"], params["bv"] = init_linear(ks[2], d_model, d_k * n_heads)
    params["wo_t"], params["bo"] = init_linear(ks[3], d_k * n_heads, d_model)

    queries = jax.random.normal(ks[4], (B, L, d_model), jnp.float32)
    keys_in = jax.random.normal(ks[5], (B, S, d_model), jnp.float32)
    values_in = jax.random.normal(ks[6], (B, S, d_model), jnp.float32)

    fwd = jax.jit(functools.partial(auto_correlation_layer_forward,
                                    n_heads=n_heads, factor=1))
    out, attn = fwd(params, queries, keys_in, values_in)
    out = jax.block_until_ready(out)

    assert out.shape == (B, L, d_model)
    assert bool(jnp.all(jnp.isfinite(out)))

    ref = _reference_forward(params, queries, keys_in, values_in, factor=1)
    max_err = float(jnp.max(jnp.abs(out - ref)))
    assert max_err < 3e-2, f"mismatch vs FFT reference: max_err={max_err}"

    print("KERNEL_OK")
</pallas_src>

<mosaic_0001>
module attributes {stable_mosaic.version = 11 : i64} {
  func.func @_qk_corr_kernel(%arg0: i32, %arg1: memref<1x128x32xf32, #tpu.memory_space<vmem>>, %arg2: memref<1x128x32xf32, #tpu.memory_space<vmem>>, %arg3: memref<32x32xf32, #tpu.memory_space<vmem>>, %arg4: memref<1x32xf32, #tpu.memory_space<vmem>>, %arg5: memref<32x32xf32, #tpu.memory_space<vmem>>, %arg6: memref<1x32xf32, #tpu.memory_space<vmem>>, %arg7: memref<1x1x128xf32, #tpu.memory_space<vmem>>) attributes {dimension_semantics = [#tpu.dimension_semantics<parallel>], iteration_bounds = array<i64: 2>, scalar_prefetch = 0 : i64, scratch_operands = 0 : i64, tpu.core_type = #tpu.core_type<tc>, window_params = [{transform_indices = @transform_0, window_bounds = array<i64: 1, 128, 32>}, {transform_indices = @transform_1, window_bounds = array<i64: 1, 128, 32>}, {pipeline_mode = #tpu.pipeline_mode<synchronous>, transform_indices = @transform_2, window_bounds = array<i64: 32, 32>}, {pipeline_mode = #tpu.pipeline_mode<synchronous>, transform_indices = @transform_3, window_bounds = array<i64: 1, 32>}, {pipeline_mode = #tpu.pipeline_mode<synchronous>, transform_indices = @transform_4, window_bounds = array<i64: 32, 32>}, {pipeline_mode = #tpu.pipeline_mode<synchronous>, transform_indices = @transform_5, window_bounds = array<i64: 1, 32>}, {transform_indices = @transform_6, window_bounds = array<i64: 1, 1, 128>}]} {
    %c0 = arith.constant 0 : index
    %c0_0 = arith.constant 0 : index
    %c0_1 = arith.constant 0 : index
    %0 = vector.load %arg1[%c0, %c0_0, %c0_1] : memref<1x128x32xf32, #tpu.memory_space<vmem>>, vector<1x128x32xf32>
    %1 = vector.shape_cast %0 : vector<1x128x32xf32> to vector<128x32xf32>
    %2 = arith.truncf %1 : vector<128x32xf32> to vector<128x32xbf16>
    %c0_2 = arith.constant 0 : index
    %c0_3 = arith.constant 0 : index
    %3 = vector.load %arg3[%c0_2, %c0_3] : memref<32x32xf32, #tpu.memory_space<vmem>>, vector<32x32xf32>
    %4 = arith.truncf %3 : vector<32x32xf32> to vector<32x32xbf16>
    %cst = arith.constant dense<0.000000e+00> : vector<128x32xf32>
    %5 = tpu.matmul %2, %4, %cst {dimension_numbers = #tpu.dot_dimension_numbers<[1], [0], [0], [1], [0, 0, 1, 1], [], []>} : vector<128x32xbf16>, vector<32x32xbf16>, vector<128x32xf32> -> vector<128x32xf32>
    %c0_4 = arith.constant 0 : index
    %c0_5 = arith.constant 0 : index
    %6 = vector.load %arg4[%c0_4, %c0_5] : memref<1x32xf32, #tpu.memory_space<vmem>>, vector<1x32xf32>
    %7 = vector.broadcast %6 : vector<1x32xf32> to vector<128x32xf32>
    %8 = arith.addf %5, %7 : vector<128x32xf32>
    %c0_6 = arith.constant 0 : index
    %c0_7 = arith.constant 0 : index
    %c0_8 = arith.constant 0 : index
    %9 = vector.load %arg2[%c0_6, %c0_7, %c0_8] : memref<1x128x32xf32, #tpu.memory_space<vmem>>, vector<1x128x32xf32>
    %10 = vector.shape_cast %9 : vector<1x128x32xf32> to vector<128x32xf32>
    %11 = arith.truncf %10 : vector<128x32xf32> to vector<128x32xbf16>
    %c0_9 = arith.constant 0 : index
    %c0_10 = arith.constant 0 : index
    %12 = vector.load %arg5[%c0_9, %c0_10] : memref<32x32xf32, #tpu.memory_space<vmem>>, vector<32x32xf32>
    %13 = arith.truncf %12 : vector<32x32xf32> to vector<32x32xbf16>
    %cst_11 = arith.constant dense<0.000000e+00> : vector<128x32xf32>
    %14 = tpu.matmul %11, %13, %cst_11 {dimension_numbers = #tpu.dot_dimension_numbers<[1], [0], [0], [1], [0, 0, 1, 1], [], []>} : vector<128x32xbf16>, vector<32x32xbf16>, vector<128x32xf32> -> vector<128x32xf32>
    %c0_12 = arith.constant 0 : index
    %c0_13 = arith.constant 0 : index
    %15 = vector.load %arg6[%c0_12, %c0_13] : memref<1x32xf32, #tpu.memory_space<vmem>>, vector<1x32xf32>
    %16 = vector.broadcast %15 : vector<1x32xf32> to vector<128x32xf32>
    %17 = arith.addf %14, %16 : vector<128x32xf32>
    %18 = arith.truncf %17 : vector<128x32xf32> to vector<128x32xbf16>
    %19 = arith.truncf %8 : vector<128x32xf32> to vector<128x32xbf16>
    %cst_14 = arith.constant dense<0.000000e+00> : vector<128x128xf32>
    %20 = tpu.matmul %18, %19, %cst_14 {dimension_numbers = #tpu.dot_dimension_numbers<[1], [1], [0], [0], [0, 0, 1, 0], [], []>} : vector<128x32xbf16>, vector<128x32xbf16>, vector<128x128xf32> -> vector<128x128xf32>
    %21 = tpu.iota {dimensions = array<i32: 0>} : vector<128x1xi32>
    %c1_i32 = arith.constant 1 : i32
    %22 = vector.broadcast %c1_i32 : i32 to vector<128x1xi32>
    %23 = arith.andi %21, %22 : vector<128x1xi32>
    %c0_i32 = arith.constant 0 : i32
    %24 = vector.broadcast %c0_i32 : i32 to vector<128x1xi32>
    %25 = arith.cmpi ne, %23, %24 : vector<128x1xi32>
    %c127_i32 = arith.constant 127 : i32
    %26 = tpu.dynamic_rotate %20 by %c127_i32 dim 1 : vector<128x128xf32>, i32 -> vector<128x128xf32>
    %27 = vector.shape_cast %25 : vector<128x1xi1> to vector<128x1xi1>
    %28 = vector.broadcast %27 : vector<128x1xi1> to vector<128x128xi1>
    %29 = arith.select %28, %26, %20 : vector<128x128xi1>, vector<128x128xf32>
    %c2_i32 = arith.constant 2 : i32
    %30 = vector.broadcast %c2_i32 : i32 to vector<128x1xi32>
    %31 = arith.andi %21, %30 : vector<128x1xi32>
    %c0_i32_15 = arith.constant 0 : i32
    %32 = vector.broadcast %c0_i32_15 : i32 to vector<128x1xi32>
    %33 = arith.cmpi ne, %31, %32 : vector<128x1xi32>
    %c126_i32 = arith.constant 126 : i32
    %34 = tpu.dynamic_rotate %29 by %c126_i32 dim 1 : vector<128x128xf32>, i32 -> vector<128x128xf32>
    %35 = vector.shape_cast %33 : vector<128x1xi1> to vector<128x1xi1>
    %36 = vector.broadcast %35 : vector<128x1xi1> to vector<128x128xi1>
    %37 = arith.select %36, %34, %29 : vector<128x128xi1>, vector<128x128xf32>
    %c4_i32 = arith.constant 4 : i32
    %38 = vector.broadcast %c4_i32 : i32 to vector<128x1xi32>
    %39 = arith.andi %21, %38 : vector<128x1xi32>
    %c0_i32_16 = arith.constant 0 : i32
    %40 = vector.broadcast %c0_i32_16 : i32 to vector<128x1xi32>
    %41 = arith.cmpi ne, %39, %40 : vector<128x1xi32>
    %c124_i32 = arith.constant 124 : i32
    %42 = tpu.dynamic_rotate %37 by %c124_i32 dim 1 : vector<128x128xf32>, i32 -> vector<128x128xf32>
    %43 = vector.shape_cast %41 : vector<128x1xi1> to vector<128x1xi1>
    %44 = vector.broadcast %43 : vector<128x1xi1> to vector<128x128xi1>
    %45 = arith.select %44, %42, %37 : vector<128x128xi1>, vector<128x128xf32>
    %c8_i32 = arith.constant 8 : i32
    %46 = vector.broadcast %c8_i32 : i32 to vector<128x1xi32>
    %47 = arith.andi %21, %46 : vector<128x1xi32>
    %c0_i32_17 = arith.constant 0 : i32
    %48 = vector.broadcast %c0_i32_17 : i32 to vector<128x1xi32>
    %49 = arith.cmpi ne, %47, %48 : vector<128x1xi32>
    %c120_i32 = arith.constant 120 : i32
    %50 = tpu.dynamic_rotate %45 by %c120_i32 dim 1 : vector<128x128xf32>, i32 -> vector<128x128xf32>
    %51 = vector.shape_cast %49 : vector<128x1xi1> to vector<128x1xi1>
    %52 = vector.broadcast %51 : vector<128x1xi1> to vector<128x128xi1>
    %53 = arith.select %52, %50, %45 : vector<128x128xi1>, vector<128x128xf32>
    %c16_i32 = arith.constant 16 : i32
    %54 = vector.broadcast %c16_i32 : i32 to vector<128x1xi32>
    %55 = arith.andi %21, %54 : vector<128x1xi32>
    %c0_i32_18 = arith.constant 0 : i32
    %56 = vector.broadcast %c0_i32_18 : i32 to vector<128x1xi32>
    %57 = arith.cmpi ne, %55, %56 : vector<128x1xi32>
    %c112_i32 = arith.constant 112 : i32
    %58 = tpu.dynamic_rotate %53 by %c112_i32 dim 1 : vector<128x128xf32>, i32 -> vector<128x128xf32>
    %59 = vector.shape_cast %57 : vector<128x1xi1> to vector<128x1xi1>
    %60 = vector.broadcast %59 : vector<128x1xi1> to vector<128x128xi1>
    %61 = arith.select %60, %58, %53 : vector<128x128xi1>, vector<128x128xf32>
    %c32_i32 = arith.constant 32 : i32
    %62 = vector.broadcast %c32_i32 : i32 to vector<128x1xi32>
    %63 = arith.andi %21, %62 : vector<128x1xi32>
    %c0_i32_19 = arith.constant 0 : i32
    %64 = vector.broadcast %c0_i32_19 : i32 to vector<128x1xi32>
    %65 = arith.cmpi ne, %63, %64 : vector<128x1xi32>
    %c96_i32 = arith.constant 96 : i32
    %66 = tpu.dynamic_rotate %61 by %c96_i32 dim 1 : vector<128x128xf32>, i32 -> vector<128x128xf32>
    %67 = vector.shape_cast %65 : vector<128x1xi1> to vector<128x1xi1>
    %68 = vector.broadcast %67 : vector<128x1xi1> to vector<128x128xi1>
    %69 = arith.select %68, %66, %61 : vector<128x128xi1>, vector<128x128xf32>
    %c64_i32 = arith.constant 64 : i32
    %70 = vector.broadcast %c64_i32 : i32 to vector<128x1xi32>
    %71 = arith.andi %21, %70 : vector<128x1xi32>
    %c0_i32_20 = arith.constant 0 : i32
    %72 = vector.broadcast %c0_i32_20 : i32 to vector<128x1xi32>
    %73 = arith.cmpi ne, %71, %72 : vector<128x1xi32>
    %c64_i32_21 = arith.constant 64 : i32
    %74 = tpu.dynamic_rotate %69 by %c64_i32_21 dim 1 : vector<128x128xf32>, i32 -> vector<128x128xf32>
    %75 = vector.shape_cast %73 : vector<128x1xi1> to vector<128x1xi1>
    %76 = vector.broadcast %75 : vector<128x1xi1> to vector<128x128xi1>
    %77 = arith.select %76, %74, %69 : vector<128x128xi1>, vector<128x128xf32>
    %cst_22 = arith.constant dense<0.000000e+00> : vector<128xf32>
    %78 = vector.multi_reduction <add>, %77, %cst_22 [0] : vector<128x128xf32> to vector<128xf32>
    %79 = vector.shape_cast %78 : vector<128xf32> to vector<1x128xf32>
    %cst_23 = arith.constant 3.125000e-02 : f32
    %80 = vector.broadcast %cst_23 : f32 to vector<1x128xf32>
    %81 = arith.mulf %79, %80 : vector<1x128xf32>
    %c0_24 = arith.constant 0 : index
    %c0_25 = arith.constant 0 : index
    %c0_26 = arith.constant 0 : index
    %82 = vector.load %arg7[%c0_24, %c0_25, %c0_26] : memref<1x1x128xf32, #tpu.memory_space<vmem>>, vector<1x1x128xf32>
    %83 = vector.shape_cast %82 : vector<1x1x128xf32> to vector<1x128xf32>
    %84 = vector.shape_cast %81 : vector<1x128xf32> to vector<1x1x128xf32>
    tpu.vector_store %arg7[%c0_24, %c0_25, %c0_26], %84 {strides = array<i32>} : memref<1x1x128xf32, #tpu.memory_space<vmem>>, vector<1x1x128xf32>,
    return
  }
  func.func @transform_0(%arg0: i32) -> (i32, i32, i32) {
    %c0_i32 = arith.constant 0 : i32
    %c0_i32_0 = arith.constant 0 : i32
    %c0_i32_1 = arith.constant 0 : i32
    return %arg0, %c0_i32, %c0_i32_0 : i32, i32, i32
  }
  func.func @transform_1(%arg0: i32) -> (i32, i32, i32) {
    %c0_i32 = arith.constant 0 : i32
    %c0_i32_0 = arith.constant 0 : i32
    %c0_i32_1 = arith.constant 0 : i32
    return %arg0, %c0_i32, %c0_i32_0 : i32, i32, i32
  }
  func.func @transform_2(%arg0: i32) -> (i32, i32) {
    %c0_i32 = arith.constant 0 : i32
    %c0_i32_0 = arith.constant 0 : i32
    %c0_i32_1 = arith.constant 0 : i32
    return %c0_i32, %c0_i32_0 : i32, i32
  }
  func.func @transform_3(%arg0: i32) -> (i32, i32) {
    %c0_i32 = arith.constant 0 : i32
    %c0_i32_0 = arith.constant 0 : i32
    %c0_i32_1 = arith.constant 0 : i32
    return %c0_i32, %c0_i32_0 : i32, i32
  }
  func.func @transform_4(%arg0: i32) -> (i32, i32) {
    %c0_i32 = arith.constant 0 : i32
    %c0_i32_0 = arith.constant 0 : i32
    %c0_i32_1 = arith.constant 0 : i32
    return %c0_i32, %c0_i32_0 : i32, i32
  }
  func.func @transform_5(%arg0: i32) -> (i32, i32) {
    %c0_i32 = arith.constant 0 : i32
    %c0_i32_0 = arith.constant 0 : i32
    %c0_i32_1 = arith.constant 0 : i32
    return %c0_i32, %c0_i32_0 : i32, i32
  }
  func.func @transform_6(%arg0: i32) -> (i32, i32, i32) {
    %c0_i32 = arith.constant 0 : i32
    %c0_i32_0 = arith.constant 0 : i32
    %c0_i32_1 = arith.constant 0 : i32
    return %arg0, %c0_i32, %c0_i32_0 : i32, i32, i32
  }
}

module attributes {stable_mosaic.version = 11 : i64} {
  func.func @_v_agg_out_kernel(%arg0: i32, %arg1: memref<2x4xf32, #tpu.memory_space<smem>>, %arg2: memref<4xi32, #tpu.memory_space<smem>>, %arg3: memref<1x128x32xf32, #tpu.memory_space<vmem>>, %arg4: memref<32x32xf32, #tpu.memory_space<vmem>>, %arg5: memref<1x32xf32, #tpu.memory_space<vmem>>, %arg6: memref<32x32xf32, #tpu.memory_space<vmem>>, %arg7: memref<1x32xf32, #tpu.memory_space<vmem>>, %arg8: memref<1x128x32xf32, #tpu.memory_space<vmem>>, %arg9: memref<256x32xf32, #tpu.memory_space<vmem>>) attributes {dimension_semantics = [#tpu.dimension_semantics<parallel>], iteration_bounds = array<i64: 2>, scalar_prefetch = 0 : i64, scratch_operands = 1 : i64, tpu.core_type = #tpu.core_type<tc>, window_params = [{transform_indices = @transform_0, window_bounds = array<i64: 2, 4>}, {transform_indices = @transform_1, window_bounds = array<i64: 4>}, {transform_indices = @transform_2, window_bounds = array<i64: 1, 128, 32>}, {pipeline_mode = #tpu.pipeline_mode<synchronous>, transform_indices = @transform_3, window_bounds = array<i64: 32, 32>}, {pipeline_mode = #tpu.pipeline_mode<synchronous>, transform_indices = @transform_4, window_bounds = array<i64: 1, 32>}, {pipeline_mode = #tpu.pipeline_mode<synchronous>, transform_indices = @transform_5, window_bounds = array<i64: 32, 32>}, {pipeline_mode = #tpu.pipeline_mode<synchronous>, transform_indices = @transform_6, window_bounds = array<i64: 1, 32>}, {transform_indices = @transform_7, window_bounds = array<i64: 1, 128, 32>}]} {
    %c0 = arith.constant 0 : index
    %0 = memref.load %arg2[%c0] : memref<4xi32, #tpu.memory_space<smem>>
    %c1 = arith.constant 1 : index
    %1 = memref.load %arg2[%c1] : memref<4xi32, #tpu.memory_space<smem>>
    %c2 = arith.constant 2 : index
    %2 = memref.load %arg2[%c2] : memref<4xi32, #tpu.memory_space<smem>>
    %c3 = arith.constant 3 : index
    %3 = memref.load %arg2[%c3] : memref<4xi32, #tpu.memory_space<smem>>
    %4 = arith.index_cast %arg0 : i32 to index
    %c0_0 = arith.constant 0 : index
    %5 = memref.load %arg1[%4, %c0_0] : memref<2x4xf32, #tpu.memory_space<smem>>
    %6 = arith.index_cast %arg0 : i32 to index
    %c1_1 = arith.constant 1 : index
    %7 = memref.load %arg1[%6, %c1_1] : memref<2x4xf32, #tpu.memory_space<smem>>
    %8 = arith.index_cast %arg0 : i32 to index
    %c2_2 = arith.constant 2 : index
    %9 = memref.load %arg1[%8, %c2_2] : memref<2x4xf32, #tpu.memory_space<smem>>
    %10 = arith.index_cast %arg0 : i32 to index
    %c3_3 = arith.constant 3 : index
    %11 = memref.load %arg1[%10, %c3_3] : memref<2x4xf32, #tpu.memory_space<smem>>
    %c0_4 = arith.constant 0 : index
    %c0_5 = arith.constant 0 : index
    %c0_6 = arith.constant 0 : index
    %12 = vector.load %arg3[%c0_4, %c0_5, %c0_6] : memref<1x128x32xf32, #tpu.memory_space<vmem>>, vector<1x128x32xf32>
    %13 = vector.shape_cast %12 : vector<1x128x32xf32> to vector<128x32xf32>
    %14 = arith.truncf %13 : vector<128x32xf32> to vector<128x32xbf16>
    %c0_7 = arith.constant 0 : index
    %c0_8 = arith.constant 0 : index
    %15 = vector.load %arg4[%c0_7, %c0_8] : memref<32x32xf32, #tpu.memory_space<vmem>>, vector<32x32xf32>
    %16 = arith.truncf %15 : vector<32x32xf32> to vector<32x32xbf16>
    %cst = arith.constant dense<0.000000e+00> : vector<128x32xf32>
    %17 = tpu.matmul %14, %16, %cst {dimension_numbers = #tpu.dot_dimension_numbers<[1], [0], [0], [1], [0, 0, 1, 1], [], []>} : vector<128x32xbf16>, vector<32x32xbf16>, vector<128x32xf32> -> vector<128x32xf32>
    %c0_9 = arith.constant 0 : index
    %c0_10 = arith.constant 0 : index
    %18 = vector.load %arg5[%c0_9, %c0_10] : memref<1x32xf32, #tpu.memory_space<vmem>>, vector<1x32xf32>
    %19 = vector.broadcast %18 : vector<1x32xf32> to vector<128x32xf32>
    %20 = arith.addf %17, %19 : vector<128x32xf32>
    %c0_11 = arith.constant 0 : index
    %c0_12 = arith.constant 0 : index
    %21 = vector.load %arg9[%c0_11, %c0_12] : memref<256x32xf32, #tpu.memory_space<vmem>>, vector<128x32xf32>
    tpu.vector_store %arg9[%c0_11, %c0_12], %20 {strides = array<i32>} : memref<256x32xf32, #tpu.memory_space<vmem>>, vector<128x32xf32>,
    %c128 = arith.constant 128 : index
    %c0_13 = arith.constant 0 : index
    %22 = vector.load %arg9[%c128, %c0_13] : memref<256x32xf32, #tpu.memory_space<vmem>>, vector<128x32xf32>
    tpu.vector_store %arg9[%c128, %c0_13], %20 {strides = array<i32>} : memref<256x32xf32, #tpu.memory_space<vmem>>, vector<128x32xf32>,
    %23 = arith.index_cast %0 : i32 to index
    %c0_14 = arith.constant 0 : index
    %24 = vector.load %arg9[%23, %c0_14] : memref<256x32xf32, #tpu.memory_space<vmem>>, vector<128x32xf32>
    %25 = vector.broadcast %5 : f32 to vector<128x32xf32>
    %26 = arith.mulf %25, %24 : vector<128x32xf32>
    %27 = arith.index_cast %1 : i32 to index
    %c0_15 = arith.constant 0 : index
    %28 = vector.load %arg9[%27, %c0_15] : memref<256x32xf32, #tpu.memory_space<vmem>>, vector<128x32xf32>
    %29 = vector.broadcast %7 : f32 to vector<128x32xf32>
    %30 = arith.mulf %29, %28 : vector<128x32xf32>
    %31 = arith.addf %26, %30 : vector<128x32xf32>
    %32 = arith.index_cast %2 : i32 to index
    %c0_16 = arith.constant 0 : index
    %33 = vector.load %arg9[%32, %c0_16] : memref<256x32xf32, #tpu.memory_space<vmem>>, vector<128x32xf32>
    %34 = vector.broadcast %9 : f32 to vector<128x32xf32>
    %35 = arith.mulf %34, %33 : vector<128x32xf32>
    %36 = arith.addf %31, %35 : vector<128x32xf32>
    %37 = arith.index_cast %3 : i32 to index
    %c0_17 = arith.constant 0 : index
    %38 = vector.load %arg9[%37, %c0_17] : memref<256x32xf32, #tpu.memory_space<vmem>>, vector<128x32xf32>
    %39 = vector.broadcast %11 : f32 to vector<128x32xf32>
    %40 = arith.mulf %39, %38 : vector<128x32xf32>
    %41 = arith.addf %36, %40 : vector<128x32xf32>
    %42 = arith.truncf %41 : vector<128x32xf32> to vector<128x32xbf16>
    %c0_18 = arith.constant 0 : index
    %c0_19 = arith.constant 0 : index
    %43 = vector.load %arg6[%c0_18, %c0_19] : memref<32x32xf32, #tpu.memory_space<vmem>>, vector<32x32xf32>
    %44 = arith.truncf %43 : vector<32x32xf32> to vector<32x32xbf16>
    %cst_20 = arith.constant dense<0.000000e+00> : vector<128x32xf32>
    %45 = tpu.matmul %42, %44, %cst_20 {dimension_numbers = #tpu.dot_dimension_numbers<[1], [0], [0], [1], [0, 0, 1, 1], [], []>} : vector<128x32xbf16>, vector<32x32xbf16>, vector<128x32xf32> -> vector<128x32xf32>
    %c0_21 = arith.constant 0 : index
    %c0_22 = arith.constant 0 : index
    %46 = vector.load %arg7[%c0_21, %c0_22] : memref<1x32xf32, #tpu.memory_space<vmem>>, vector<1x32xf32>
    %47 = vector.broadcast %46 : vector<1x32xf32> to vector<128x32xf32>
    %48 = arith.addf %45, %47 : vector<128x32xf32>
    %c0_23 = arith.constant 0 : index
    %c0_24 = arith.constant 0 : index
    %c0_25 = arith.constant 0 : index
    %49 = vector.load %arg8[%c0_23, %c0_24, %c0_25] : memref<1x128x32xf32, #tpu.memory_space<vmem>>, vector<1x128x32xf32>
    %50 = vector.shape_cast %49 : vector<1x128x32xf32> to vector<128x32xf32>
    %51 = vector.shape_cast %48 : vector<128x32xf32> to vector<1x128x32xf32>
    tpu.vector_store %arg8[%c0_23, %c0_24, %c0_25], %51 {strides = array<i32>} : memref<1x128x32xf32, #tpu.memory_space<vmem>>, vector<1x128x32xf32>,
    return
  }
  func.func @transform_0(%arg0: i32) -> (i32, i32) {
    %c0_i32 = arith.constant 0 : i32
    %c0_i32_0 = arith.constant 0 : i32
    %c0_i32_1 = arith.constant 0 : i32
    return %c0_i32, %c0_i32_0 : i32, i32
  }
  func.func @transform_1(%arg0: i32) -> i32 {
    %c0_i32 = arith.constant 0 : i32
    %c0_i32_0 = arith.constant 0 : i32
    return %c0_i32 : i32
  }
  func.func @transform_2(%arg0: i32) -> (i32, i32, i32) {
    %c0_i32 = arith.constant 0 : i32
    %c0_i32_0 = arith.constant 0 : i32
    %c0_i32_1 = arith.constant 0 : i32
    return %arg0, %c0_i32, %c0_i32_0 : i32, i32, i32
  }
  func.func @transform_3(%arg0: i32) -> (i32, i32) {
    %c0_i32 = arith.constant 0 : i32
    %c0_i32_0 = arith.constant 0 : i32
    %c0_i32_1 = arith.constant 0 : i32
    return %c0_i32, %c0_i32_0 : i32, i32
  }
  func.func @transform_4(%arg0: i32) -> (i32, i32) {
    %c0_i32 = arith.constant 0 : i32
    %c0_i32_0 = arith.constant 0 : i32
    %c0_i32_1 = arith.constant 0 : i32
    return %c0_i32, %c0_i32_0 : i32, i32
  }
  func.func @transform_5(%arg0: i32) -> (i32, i32) {
    %c0_i32 = arith.constant 0 : i32
    %c0_i32_0 = arith.constant 0 : i32
    %c0_i32_1 = arith.constant 0 : i32
    return %c0_i32, %c0_i32_0 : i32, i32
  }
  func.func @transform_6(%arg0: i32) -> (i32, i32) {
    %c0_i32 = arith.constant 0 : i32
    %c0_i32_0 = arith.constant 0 : i32
    %c0_i32_1 = arith.constant 0 : i32
    return %c0_i32, %c0_i32_0 : i32, i32
  }
  func.func @transform_7(%arg0: i32) -> (i32, i32, i32) {
    %c0_i32 = arith.constant 0 : i32
    %c0_i32_0 = arith.constant 0 : i32
    %c0_i32_1 = arith.constant 0 : i32
    return %arg0, %c0_i32, %c0_i32_0 : i32, i32, i32
  }
}

</mosaic_0001>

<bundles_post_ra>
// kernel: auto_correlation_layer_forward.3
= control target key start
LH: loop header
LB: loop body
LE: loop exit
PB: predicated region body
PF: predicated region fallthrough
CT: control target
= control target key end

     0   :  { %12 = vsyncpa [#allocation4], 0  ;;  %s1329_s0 = inlined_call_operand.vmem [shape: f32[2,4], index: 0, kind: input, shape index: {}]   ;;  %s1330_s1 = inlined_call_operand.vmem [shape: s32[4], index: 1, kind: input, shape index: {}]   ;;  %s1331_s2 = inlined_call_operand.vmem [shape: f32[2,128,32], index: 2, kind: input, shape index: {}]   ;;  %s1332_s3 = inlined_call_operand.vmem [shape: f32[32,32], index: 3, kind: input, shape index: {}]   ;;  %s1333_s4 = inlined_call_operand.vmem [shape: f32[1,32], index: 4, kind: input, shape index: {}]   ;;  %s1334_s5 = inlined_call_operand.vmem [shape: f32[32,32], index: 5, kind: input, shape index: {}]   ;;  %s1335_s6 = inlined_call_operand.vmem [shape: f32[1,32], index: 6, kind: input, shape index: {}]   ;;  %s1336_s7 = inlined_call_operand.vmem [shape: f32[2,128,32], index: 7, kind: output, shape index: {}]  }
   0x1   :  { %13 = vsyncpa [#allocation6], 0  ;;  %s991_s24 = smov 0  }
   0x2 LB: > { %s997_s25 = sadd.s32 4294967295, %s947_s24   ;;  %p833_p0 = scmp.ge.s32.totalorder %s947_s24, 1  ;;  %s947_s24 = sphi %s991_s24, %s19_s24  }
   0x3   : > { %p202_p1 = scmp.lt.s32.totalorder %s947_s24, 3  ;;  %s214_s28 = sshll.u32 %s1329_s0, 4  ;;  %s215_s28 = int_to_ptr.vmem [resolvable:$true] %s214_s28 }
   0x4   : > { %p887_p3 = scmp.eq.s32.totalorder %s997_s25, 0  ;;  %s224_s8 = sshll.u32 %s1330_s1, 4  ;;  %s225_s8 = int_to_ptr.vmem [resolvable:$true] %s224_s8 }
   0x5   : > { %p203_p2 = pnand %p833_p0, %p202_p1  ;;  %s949_s9 = smov [#allocation3]  }
   0x6   : > { %s950_s10 = smov [#allocation5]  }
   0x7   : > { %p880_p4 = pneg %p203_p2 }
   0x8   : > { %257 = sbr.rel (%p203_p2) target bundleno = 433 (0x1b1), region = 48 }
   0x9   : > { %p881_p5 = pnand %p887_p3, %p880_p4 }
   0xb   : > { %883 = dma.vmem_to_smem (!%p881_p5), %s215_s28, 32, %s949_s9, [#allocation4]  }
   0xc   : > { %886 = dma.vmem_to_smem (!%p881_p5), %s225_s8, 16, %s950_s10, [#allocation6]  }
   0xd   : > { %938 = dma.done.wait (%p887_p3), [#allocation4], 32  }
   0xe   : > { %940 = vsyncadd (%p887_p3), [#allocation4], 4294967264 }
   0xf   : > { %942 = dma.done.wait (%p887_p3), [#allocation6], 16  }
  0x10   : > { %944 = vsyncadd (%p887_p3), [#allocation6], 4294967280 }
  0x11   : > { %269 = sfence }
  0x12   : > { %v345_v0 = vld [vmem:[%s1332_s3 + $0x10] sm:$0xff]  ;;  %v346_v1 = vld [vmem:[%s1332_s3 + $0x18] sm:$0xff]  ;;  %v343_v2 = vld [vmem:[%s1332_s3] sm:$0xff]  ;;  %p296_p6 = scmp.lt.s32.totalorder %s997_s25, 1  ;;  %vm353_vm0 = vcmask 261120   ;;  %s847_s13 = sshll.u32 %s997_s25, 7 }
  0x13   : > { %v348_v3 = vpack.c.bf16 %v346_v1, %v345_v0  ;;  %v344_v4 = vld [vmem:[%s1332_s3 + $0x8] sm:$0xff]  ;;  %v1069_v30 = vld [vmem:[%s1333_s4] ss:$0 sm:$0xff]  ;;  %v653_v49 = vld [vmem:[%s1334_s5 + $0x10] sm:$0xff]  ;;  %s307_s14 = sld [smem:[#allocation5]]  ;;  %s313_s16 = sadd.s32 1, %s847_s13 }
  0x14   : > { %s1032_s19 = scalar_select %p296_p6, %s997_s25, 1  ;;  %v347_v5 = vpack.c.bf16 %v344_v4, %v343_v2  ;;  %v654_v50 = vld [vmem:[%s1334_s5 + $0x18] sm:$0xff]  ;;  %v651_v51 = vld [vmem:[%s1334_s5] sm:$0xff]  ;;  %v652_v53 = vld [vmem:[%s1334_s5 + $0x8] sm:$0xff] }
  0x15   : > { %384 = vmatpush.bf16.msra.mxu0 %v348_v3  ;;  %868 = vmatpush.bf16.msra.mxu2 %v348_v3  ;;  %v656_v52 = vpack.c.bf16 %v654_v50, %v653_v49  ;;  %v655_v54 = vpack.c.bf16 %v652_v53, %v651_v51  ;;  %s844_s15 = sld [smem:[#allocation5 + $0x1]]  ;;  %s315_s21 = sadd.s32 2, %s847_s13 }
  0x16   : > { %s866_s20 = sshll.u32 %s1032_s19, 7  ;;  %s845_s17 = sld [smem:[#allocation5 + $0x2]] }
  0x17   : > { %s1040_s23 = scalar_lea.vmem %s1331_s2, %s866_s20  ;;  %691 = vmatpush.bf16.msra.mxu1 %v656_v52  ;;  %870 = vmatpush.bf16.msra.mxu3 %v656_v52  ;;  %s312_s18 = sld [smem:[#allocation3 + %s847_s13]] }
  0x18   : > { %v319_v6 = vld [vmem:[%s1040_s23] sm:$0xff]  ;;  %v320_v7 = vld [vmem:[%s1040_s23 + $0x8] sm:$0xff]  ;;  %v321_v12 = vld [vmem:[%s1040_s23 + $0x10] sm:$0xff]  ;;  %s314_s22 = sld [smem:[#allocation3 + %s313_s16]]  ;;  %s317_s26 = sadd.s32 3, %s847_s13 }
  0x19   : > { %v327_v8 = vld [vmem:[%s1040_s23 + $0x40] sm:$0xff]  ;;  %385 = vmatpush.bf16.msra.mxu0 %v347_v5  ;;  %869 = vmatpush.bf16.msra.mxu2 %v347_v5  ;;  %v335_v9 = vpack.c.bf16 %v320_v7, %v319_v6  ;;  %v328_v10 = vld [vmem:[%s1040_s23 + $0x48] sm:$0xff]  ;;  %v322_v13 = vld [vmem:[%s1040_s23 + $0x18] sm:$0xff]  ;;  %s316_s25 = sld [smem:[#allocation3 + %s315_s21]]  ;;  %s1136_s28 = scalar_lea.vmem [#allocation2], %s307_s14 }
  0x1a   : > { %v339_v11 = vpack.c.bf16 %v328_v10, %v327_v8  ;;  %v329_v14 = vld [vmem:[%s1040_s23 + $0x50] sm:$0xff]  ;;  %v330_v15 = vld [vmem:[%s1040_s23 + $0x58] sm:$0xff]  ;;  %v336_v16 = vpack.c.bf16 %v322_v13, %v321_v12  ;;  %v323_v18 = vld [vmem:[%s1040_s23 + $0x20] sm:$0xff]  ;;  %s318_s27 = sld [smem:[#allocation3 + %s317_s26]]  ;;  %s1292_s13 = scalar_lea.vmem %s1336_s7, %s866_s20 }
  0x1b   : > { %v340_v17 = vpack.c.bf16 %v330_v15, %v329_v14  ;;  %v324_v19 = vld [vmem:[%s1040_s23 + $0x28] sm:$0xff]  ;;  %v331_v20 = vld [vmem:[%s1040_s23 + $0x60] sm:$0xff]  ;;  %v325_v24 = vld [vmem:[%s1040_s23 + $0x30] sm:$0xff]  ;;  %692 = vmatpush.bf16.msra.mxu1 %v655_v54  ;;  %871 = vmatpush.bf16.msra.mxu3 %v655_v54  ;;  %s1140_s29 = scalar_lea.vmem [#allocation2], %s844_s15 }
  0x1c   : > { %848 = vmatmul.msk.bf16.vlgmr.msra.gmra.mxu0 %vm353_vm0, %v335_v9  ;;  %852 = vmatmul.msk.bf16.vlgmr.msra.gmra.mxu2 %vm353_vm0, %v339_v11  ;;  %v332_v21 = vld [vmem:[%s1040_s23 + $0x68] sm:$0xff]  ;;  %v337_v22 = vpack.c.bf16 %v324_v19, %v323_v18  ;;  %v326_v25 = vld [vmem:[%s1040_s23 + $0x38] sm:$0xff]  ;;  %v333_v26 = vld [vmem:[%s1040_s23 + $0x70] sm:$0xff]  ;;  %s1149_s30 = scalar_lea.vmem [#allocation2], %s845_s17 }
  0x1d   : > { %v341_v23 = vpack.c.bf16 %v332_v21, %v331_v20  ;;  %v334_v27 = vld [vmem:[%s1040_s23 + $0x78] sm:$0xff]  ;;  %v338_v28 = vpack.c.bf16 %v326_v25, %v325_v24  ;;  %s846_s23 = sld [smem:[#allocation5 + $0x3]]  ;;  %v1132_v5 = vstv %s312_s18 }
  0x1e   : > { %v342_v29 = vpack.c.bf16 %v334_v27, %v333_v26  ;;  %v1134_v6 = vstv %s314_s22 }
  0x1f   : > { %v1143_v10 = vstv %s316_s25 }
  0x20   : > { %v1158_v20 = vstv %s318_s27 }
  0x23   : > { %s1154_s8 = scalar_lea.vmem [#allocation2], %s846_s23 }
  0x2c   : > { %849 = vmatmul.msk.bf16.gmra.mxu0 %vm353_vm0, %v336_v16  ;;  %853 = vmatmul.msk.bf16.gmra.mxu2 %vm353_vm0, %v340_v17 }
  0x3c   : > { %850 = vmatmul.msk.bf16.gmra.mxu0 %vm353_vm0, %v337_v22  ;;  %854 = vmatmul.msk.bf16.gmra.mxu2 %vm353_vm0, %v341_v23 }
  0x4c   : > { %851 = vmatmul.msk.bf16.gmra.mxu0 %vm353_vm0, %v338_v28  ;;  %855 = vmatmul.msk.bf16.gmra.mxu2 %vm353_vm0, %v342_v29 }
  0x99   : > { %v387_v31 = vpop.f32.mrf.mxu0 }
  0x9a   : > { %v388_v32 = vadd.f32 %v1069_v30, %v387_v31 }
  0x9c   : > { %427 = vst.msk [vmem:[#allocation2] sm:$0xff] %vm353_vm0, %v388_v32 }
  0x9d   : > { %443 = vst.msk [vmem:[#allocation2 + $0x80] sm:$0xff] %vm353_vm0, %v388_v32 }
  0x9f   : > { %v407_v33 = vpop.f32.mrf.mxu2 }
  0xa0   : > { %v408_v34 = vadd.f32 %v1069_v30, %v407_v33 }
  0xa1   : > { %v389_v35 = vpop.f32.mrf.mxu0 }
  0xa2   : > { %435 = vst.msk [vmem:[#allocation2 + $0x40] sm:$0xff] %vm353_vm0, %v408_v34  ;;  %v390_v36 = vadd.f32 %v1069_v30, %v389_v35 }
  0xa3   : > { %451 = vst.msk [vmem:[#allocation2 + $0xc0] sm:$0xff] %vm353_vm0, %v408_v34 }
  0xa4   : > { %428 = vst.msk [vmem:[#allocation2 + $0x8] sm:$0xff] %vm353_vm0, %v390_v36 }
  0xa5   : > { %444 = vst.msk [vmem:[#allocation2 + $0x88] sm:$0xff] %vm353_vm0, %v390_v36 }
  0xa7   : > { %v409_v37 = vpop.f32.mrf.mxu2 }
  0xa8   : > { %v410_v38 = vadd.f32 %v1069_v30, %v409_v37 }
  0xa9   : > { %v392_v39 = vpop.f32.mrf.mxu0 }
  0xaa   : > { %436 = vst.msk [vmem:[#allocation2 + $0x48] sm:$0xff] %vm353_vm0, %v410_v38  ;;  %v393_v40 = vadd.f32 %v1069_v30, %v392_v39 }
  0xab   : > { %452 = vst.msk [vmem:[#allocation2 + $0xc8] sm:$0xff] %vm353_vm0, %v410_v38 }
  0xac   : > { %429 = vst.msk [vmem:[#allocation2 + $0x10] sm:$0xff] %vm353_vm0, %v393_v40 }
  0xad   : > { %445 = vst.msk [vmem:[#allocation2 + $0x90] sm:$0xff] %vm353_vm0, %v393_v40 }
  0xaf   : > { %v412_v41 = vpop.f32.mrf.mxu2 }
  0xb0   : > { %v413_v42 = vadd.f32 %v1069_v30, %v412_v41 }
  0xb1   : > { %v394_v43 = vpop.f32.mrf.mxu0 }
  0xb2   : > { %437 = vst.msk [vmem:[#allocation2 + $0x50] sm:$0xff] %vm353_vm0, %v413_v42  ;;  %v395_v44 = vadd.f32 %v1069_v30, %v394_v43 }
  0xb3   : > { %453 = vst.msk [vmem:[#allocation2 + $0xd0] sm:$0xff] %vm353_vm0, %v413_v42 }
  0xb4   : > { %430 = vst.msk [vmem:[#allocation2 + $0x18] sm:$0xff] %vm353_vm0, %v395_v44 }
  0xb5   : > { %446 = vst.msk [vmem:[#allocation2 + $0x98] sm:$0xff] %vm353_vm0, %v395_v44 }
  0xb7   : > { %v414_v45 = vpop.f32.mrf.mxu2 }
  0xb8   : > { %v415_v46 = vadd.f32 %v1069_v30, %v414_v45 }
  0xb9   : > { %v397_v47 = vpop.f32.mrf.mxu0 }
  0xba   : > { %438 = vst.msk [vmem:[#allocation2 + $0x58] sm:$0xff] %vm353_vm0, %v415_v46  ;;  %v398_v48 = vadd.f32 %v1069_v30, %v397_v47 }
  0xbb   : > { %454 = vst.msk [vmem:[#allocation2 + $0xd8] sm:$0xff] %vm353_vm0, %v415_v46 }
  0xbc   : > { %431 = vst.msk [vmem:[#allocation2 + $0x20] sm:$0xff] %vm353_vm0, %v398_v48 }
  0xbd   : > { %447 = vst.msk [vmem:[#allocation2 + $0xa0] sm:$0xff] %vm353_vm0, %v398_v48 }
  0xbf   : > { %v417_v55 = vpop.f32.mrf.mxu2 }
  0xc0   : > { %v418_v56 = vadd.f32 %v1069_v30, %v417_v55 }
  0xc1   : > { %v399_v57 = vpop.f32.mrf.mxu0 }
  0xc2   : > { %439 = vst.msk [vmem:[#allocation2 + $0x60] sm:$0xff] %vm353_vm0, %v418_v56  ;;  %v400_v58 = vadd.f32 %v1069_v30, %v399_v57 }
  0xc3   : > { %455 = vst.msk [vmem:[#allocation2 + $0xe0] sm:$0xff] %vm353_vm0, %v418_v56 }
  0xc4   : > { %432 = vst.msk [vmem:[#allocation2 + $0x28] sm:$0xff] %vm353_vm0, %v400_v58 }
  0xc5   : > { %448 = vst.msk [vmem:[#allocation2 + $0xa8] sm:$0xff] %vm353_vm0, %v400_v58 }
  0xc7   : > { %v419_v59 = vpop.f32.mrf.mxu2 }
  0xc8   : > { %v420_v60 = vadd.f32 %v1069_v30, %v419_v59 }
  0xc9   : > { %v402_v61 = vpop.f32.mrf.mxu0 }
  0xca   : > { %440 = vst.msk [vmem:[#allocation2 + $0x68] sm:$0xff] %vm353_vm0, %v420_v60  ;;  %v403_v62 = vadd.f32 %v1069_v30, %v402_v61 }
  0xcb   : > { %456 = vst.msk [vmem:[#allocation2 + $0xe8] sm:$0xff] %vm353_vm0, %v420_v60 }
  0xcc   : > { %433 = vst.msk [vmem:[#allocation2 + $0x30] sm:$0xff] %vm353_vm0, %v403_v62 }
  0xcd   : > { %449 = vst.msk [vmem:[#allocation2 + $0xb0] sm:$0xff] %vm353_vm0, %v403_v62 }
  0xcf   : > { %v422_v63 = vpop.f32.mrf.mxu2 }
  0xd0   : > { %v423_v0 = vadd.f32 %v1069_v30, %v422_v63 }
  0xd1   : > { %v404_v1 = vpop.f32.mrf.mxu0 }
  0xd2   : > { %441 = vst.msk [vmem:[#allocation2 + $0x70] sm:$0xff] %vm353_vm0, %v423_v0  ;;  %v405_v2 = vadd.f32 %v1069_v30, %v404_v1 }
  0xd3   : > { %457 = vst.msk [vmem:[#allocation2 + $0xf0] sm:$0xff] %vm353_vm0, %v423_v0 }
  0xd4   : > { %434 = vst.msk [vmem:[#allocation2 + $0x38] sm:$0xff] %vm353_vm0, %v405_v2 }
  0xd5   : > { %450 = vst.msk [vmem:[#allocation2 + $0xb8] sm:$0xff] %vm353_vm0, %v405_v2 }
  0xd7   : > { %v424_v3 = vpop.f32.mrf.mxu2 }
  0xd8   : > { %v425_v4 = vadd.f32 %v1069_v30, %v424_v3 }
  0xda   : > { %442 = vst.msk [vmem:[#allocation2 + $0x78] sm:$0xff] %vm353_vm0, %v425_v4 }
  0xdb   : > { %458 = vst.msk [vmem:[#allocation2 + $0xf8] sm:$0xff] %vm353_vm0, %v425_v4 }
  0xe2   : > { %v460_v7 = vld [vmem:[%s1136_s28] sm:$0xff]  ;;  %v461_v8 = vld [vmem:[%s1136_s28 + $0x8] sm:$0xff]  ;;  %v462_v45 = vld [vmem:[%s1136_s28 + $0x10] sm:$0xff] }
  0xe3   : > { %v494_v9 = vld [vmem:[%s1140_s29] sm:$0xff]  ;;  %v477_v11 = vmul.f32 %v1132_v5, %v460_v7  ;;  %v478_v12 = vmul.f32 %v1132_v5, %v461_v8  ;;  %v495_v13 = vld [vmem:[%s1140_s29 + $0x8] sm:$0xff]  ;;  %v463_v46 = vld [vmem:[%s1136_s28 + $0x18] sm:$0xff]  ;;  %v479_v56 = vmul.f32 %v1132_v5, %v462_v45 }
  0xe4   : > { %v511_v14 = vmul.f32 %v1134_v6, %v494_v9  ;;  %v544_v15 = vld [vmem:[%s1149_s30] sm:$0xff]  ;;  %v545_v16 = vld [vmem:[%s1149_s30 + $0x8] sm:$0xff]  ;;  %v512_v17 = vmul.f32 %v1134_v6, %v495_v13  ;;  %v496_v47 = vld [vmem:[%s1140_s29 + $0x10] sm:$0xff]  ;;  %v480_v57 = vmul.f32 %v1132_v5, %v463_v46 }
  0xe5   : > { %v594_v18 = vld [vmem:[%s1154_s8] sm:$0xff]  ;;  %v595_v19 = vld [vmem:[%s1154_s8 + $0x8] sm:$0xff]  ;;  %v561_v23 = vmul.f32 %v1143_v10, %v544_v15  ;;  %v562_v24 = vmul.f32 %v1143_v10, %v545_v16  ;;  %v497_v50 = vld [vmem:[%s1140_s29 + $0x18] sm:$0xff]  ;;  %v513_v58 = vmul.f32 %v1134_v6, %v496_v47 }
  0xe6   : > { %v468_v21 = vld [vmem:[%s1136_s28 + $0x40] sm:$0xff]  ;;  %v527_v22 = vadd.f32 %v511_v14, %v477_v11  ;;  %v469_v25 = vld [vmem:[%s1136_s28 + $0x48] sm:$0xff]  ;;  %v528_v29 = vadd.f32 %v512_v17, %v478_v12  ;;  %v611_v37 = vmul.f32 %v1158_v20, %v594_v18  ;;  %v612_v38 = vmul.f32 %v1158_v20, %v595_v19  ;;  %v470_v55 = vld [vmem:[%s1136_s28 + $0x50] sm:$0xff] }
  0xe7   : > { %v485_v26 = vmul.f32 %v1132_v5, %v468_v21  ;;  %v502_v27 = vld [vmem:[%s1140_s29 + $0x40] sm:$0xff]  ;;  %v503_v28 = vld [vmem:[%s1140_s29 + $0x48] sm:$0xff]  ;;  %v486_v30 = vmul.f32 %v1132_v5, %v469_v25  ;;  %v471_v59 = vld [vmem:[%s1136_s28 + $0x58] sm:$0xff]  ;;  %v514_v1 = vmul.f32 %v1134_v6, %v497_v50  ;;  %v487_v2 = vmul.f32 %v1132_v5, %v470_v55 }
  0xe8   : > { %v519_v31 = vmul.f32 %v1134_v6, %v502_v27  ;;  %v520_v32 = vmul.f32 %v1134_v6, %v503_v28  ;;  %v552_v33 = vld [vmem:[%s1149_s30 + $0x40] sm:$0xff]  ;;  %v553_v34 = vld [vmem:[%s1149_s30 + $0x48] sm:$0xff]  ;;  %v577_v36 = vadd.f32 %v561_v23, %v527_v22  ;;  %v578_v41 = vadd.f32 %v562_v24, %v528_v29  ;;  %v504_v60 = vld [vmem:[%s1140_s29 + $0x50] sm:$0xff] }
  0xe9   : > { %v602_v35 = vld [vmem:[%s1154_s8 + $0x40] sm:$0xff]  ;;  %v569_v39 = vmul.f32 %v1143_v10, %v552_v33  ;;  %v603_v40 = vld [vmem:[%s1154_s8 + $0x48] sm:$0xff]  ;;  %v570_v44 = vmul.f32 %v1143_v10, %v553_v34  ;;  %v505_v61 = vld [vmem:[%s1140_s29 + $0x58] sm:$0xff]  ;;  %v488_v4 = vmul.f32 %v1132_v5, %v471_v59  ;;  %v521_v7 = vmul.f32 %v1134_v6, %v504_v60 }
  0xea   : > { %v535_v42 = vadd.f32 %v519_v31, %v485_v26  ;;  %v536_v43 = vadd.f32 %v520_v32, %v486_v30  ;;  %v627_v48 = vadd.f32 %v611_v37, %v577_v36  ;;  %v619_v49 = vmul.f32 %v1158_v20, %v602_v35  ;;  %v546_v9 = vld [vmem:[%s1149_s30 + $0x10] sm:$0xff]  ;;  %v547_v11 = vld [vmem:[%s1149_s30 + $0x18] sm:$0xff]  ;;  %v464_v37 = vld [vmem:[%s1136_s28 + $0x20] sm:$0xff] }
  0xeb   : > { %v628_v51 = vadd.f32 %v612_v38, %v578_v41  ;;  %v620_v54 = vmul.f32 %v1158_v20, %v603_v40  ;;  %v522_v8 = vmul.f32 %v1134_v6, %v505_v61  ;;  %v529_v12 = vadd.f32 %v513_v58, %v479_v56  ;;  %v554_v14 = vld [vmem:[%s1149_s30 + $0x50] sm:$0xff]  ;;  %v555_v15 = vld [vmem:[%s1149_s30 + $0x58] sm:$0xff]  ;;  %v465_v38 = vld [vmem:[%s1136_s28 + $0x28] sm:$0xff] }
  0xec   : > { %v585_v52 = vadd.f32 %v569_v39, %v535_v42  ;;  %v586_v53 = vadd.f32 %v570_v44, %v536_v43  ;;  %v530_v13 = vadd.f32 %v514_v1, %v480_v57  ;;  %v563_v16 = vmul.f32 %v1143_v10, %v546_v9  ;;  %v596_v21 = vld [vmem:[%s1154_s8 + $0x10] sm:$0xff]  ;;  %v597_v22 = vld [vmem:[%s1154_s8 + $0x18] sm:$0xff]  ;;  %v498_v39 = vld [vmem:[%s1140_s29 + $0x20] sm:$0xff] }
  0xed   : > { %v643_v62 = vpack.c.bf16 %v628_v51, %v627_v48  ;;  %v564_v17 = vmul.f32 %v1143_v10, %v547_v11  ;;  %v537_v18 = vadd.f32 %v521_v7, %v487_v2  ;;  %v538_v19 = vadd.f32 %v522_v8, %v488_v4  ;;  %v604_v27 = vld [vmem:[%s1154_s8 + $0x50] sm:$0xff]  ;;  %v605_v28 = vld [vmem:[%s1154_s8 + $0x58] sm:$0xff]  ;;  %v499_v40 = vld [vmem:[%s1140_s29 + $0x28] sm:$0xff] }
  0xee   : > { %v635_v63 = vadd.f32 %v619_v49, %v585_v52  ;;  %v636_v0 = vadd.f32 %v620_v54, %v586_v53  ;;  %v579_v23 = vadd.f32 %v563_v16, %v529_v12  ;;  %v571_v25 = vmul.f32 %v1143_v10, %v554_v14  ;;  %v472_v43 = vld [vmem:[%s1136_s28 + $0x60] sm:$0xff]  ;;  %v473_v45 = vld [vmem:[%s1136_s28 + $0x68] sm:$0xff] }
  0xef   : > { %856 = vmatmul.msk.bf16.vlgmr.msra.gmra.mxu1 %vm353_vm0, %v643_v62  ;;  %v580_v24 = vadd.f32 %v564_v17, %v530_v13  ;;  %v572_v26 = vmul.f32 %v1143_v10, %v555_v15  ;;  %v613_v29 = vmul.f32 %v1158_v20, %v596_v21  ;;  %v614_v30 = vmul.f32 %v1158_v20, %v597_v22  ;;  %v506_v46 = vld [vmem:[%s1140_s29 + $0x60] sm:$0xff]  ;;  %v507_v47 = vld [vmem:[%s1140_s29 + $0x68] sm:$0xff] }
  0xf0   : > { %v647_v3 = vpack.c.bf16 %v636_v0, %v635_v63  ;;  %v587_v31 = vadd.f32 %v571_v25, %v537_v18  ;;  %v621_v35 = vmul.f32 %v1158_v20, %v604_v27  ;;  %v622_v36 = vmul.f32 %v1158_v20, %v605_v28  ;;  %v548_v57 = vld [vmem:[%s1149_s30 + $0x20] sm:$0xff]  ;;  %v549_v58 = vld [vmem:[%s1149_s30 + $0x28] sm:$0xff]  ;;  %v500_v25 = vld [vmem:[%s1140_s29 + $0x30] sm:$0xff] }
  0xf1   : > { %v588_v32 = vadd.f32 %v572_v26, %v538_v19  ;;  %v629_v33 = vadd.f32 %v613_v29, %v579_v23  ;;  %v630_v34 = vadd.f32 %v614_v30, %v580_v24  ;;  %v481_v44 = vmul.f32 %v1132_v5, %v464_v37  ;;  %v556_v61 = vld [vmem:[%s1149_s30 + $0x60] sm:$0xff]  ;;  %v557_v62 = vld [vmem:[%s1149_s30 + $0x68] sm:$0xff]  ;;  %v466_v23 = vld [vmem:[%s1136_s28 + $0x30] sm:$0xff] }
  0xf2   : > { %860 = vmatmul.msk.bf16.vlgmr.msra.gmra.mxu3 %vm353_vm0, %v647_v3  ;;  %v637_v41 = vadd.f32 %v621_v35, %v587_v31  ;;  %v482_v49 = vmul.f32 %v1132_v5, %v465_v38  ;;  %v515_v50 = vmul.f32 %v1134_v6, %v498_v39  ;;  %v516_v51 = vmul.f32 %v1134_v6, %v499_v40  ;;  %v598_v3 = vld [vmem:[%s1154_s8 + $0x20] sm:$0xff]  ;;  %v599_v4 = vld [vmem:[%s1154_s8 + $0x28] sm:$0xff]  ;;  %v467_v24 = vld [vmem:[%s1136_s28 + $0x38] sm:$0xff] }
  0xf3   : > { %v638_v42 = vadd.f32 %v622_v36, %v588_v32  ;;  %v644_v48 = vpack.c.bf16 %v630_v34, %v629_v33  ;;  %v489_v52 = vmul.f32 %v1132_v5, %v472_v43  ;;  %v490_v54 = vmul.f32 %v1132_v5, %v473_v45  ;;  %v606_v12 = vld [vmem:[%s1154_s8 + $0x60] sm:$0xff]  ;;  %v607_v13 = vld [vmem:[%s1154_s8 + $0x68] sm:$0xff]  ;;  %v501_v26 = vld [vmem:[%s1140_s29 + $0x38] sm:$0xff] }
  0xf4   : > { %v523_v55 = vmul.f32 %v1134_v6, %v506_v46  ;;  %v524_v56 = vmul.f32 %v1134_v6, %v507_v47  ;;  %v531_v59 = vadd.f32 %v515_v50, %v481_v44  ;;  %v532_v60 = vadd.f32 %v516_v51, %v482_v49  ;;  %v474_v29 = vld [vmem:[%s1136_s28 + $0x70] sm:$0xff]  ;;  %v475_v31 = vld [vmem:[%s1136_s28 + $0x78] sm:$0xff] }
  0xf5   : > { %v648_v53 = vpack.c.bf16 %v638_v42, %v637_v41  ;;  %v565_v63 = vmul.f32 %v1143_v10, %v548_v57  ;;  %v566_v0 = vmul.f32 %v1143_v10, %v549_v58  ;;  %v573_v9 = vmul.f32 %v1143_v10, %v556_v61  ;;  %v508_v32 = vld [vmem:[%s1140_s29 + $0x70] sm:$0xff]  ;;  %v509_v33 = vld [vmem:[%s1140_s29 + $0x78] sm:$0xff] }
  0xf6   : > { %v539_v1 = vadd.f32 %v523_v55, %v489_v52  ;;  %v540_v2 = vadd.f32 %v524_v56, %v490_v54  ;;  %v574_v11 = vmul.f32 %v1143_v10, %v557_v62  ;;  %v615_v14 = vmul.f32 %v1158_v20, %v598_v3  ;;  %v550_v43 = vld [vmem:[%s1149_s30 + $0x30] sm:$0xff]  ;;  %v551_v44 = vld [vmem:[%s1149_s30 + $0x38] sm:$0xff] }
  0xf7   : > { %v581_v7 = vadd.f32 %v565_v63, %v531_v59  ;;  %v582_v8 = vadd.f32 %v566_v0, %v532_v60  ;;  %v616_v15 = vmul.f32 %v1158_v20, %v599_v4  ;;  %v623_v21 = vmul.f32 %v1158_v20, %v606_v12  ;;  %v558_v47 = vld [vmem:[%s1149_s30 + $0x70] sm:$0xff]  ;;  %v609_v58 = vld [vmem:[%s1154_s8 + $0x78] sm:$0xff] }
  0xf8   : > { %v589_v16 = vadd.f32 %v573_v9, %v539_v1  ;;  %v590_v17 = vadd.f32 %v574_v11, %v540_v2  ;;  %v624_v22 = vmul.f32 %v1158_v20, %v607_v13  ;;  %v483_v30 = vmul.f32 %v1132_v5, %v466_v23  ;;  %v600_v52 = vld [vmem:[%s1154_s8 + $0x30] sm:$0xff] }
  0xf9   : > { %v631_v18 = vadd.f32 %v615_v14, %v581_v7  ;;  %v632_v19 = vadd.f32 %v616_v15, %v582_v8  ;;  %v484_v35 = vmul.f32 %v1132_v5, %v467_v24  ;;  %v517_v36 = vmul.f32 %v1134_v6, %v500_v25  ;;  %v608_v57 = vld [vmem:[%s1154_s8 + $0x70] sm:$0xff]  ;;  %v902_v8 = vld [vmem:[%s1335_s6] ss:$0 sm:$0xff] }
  0xfa   : > { %v639_v27 = vadd.f32 %v623_v21, %v589_v16  ;;  %v640_v28 = vadd.f32 %v624_v22, %v590_v17  ;;  %v518_v37 = vmul.f32 %v1134_v6, %v501_v26  ;;  %v491_v38 = vmul.f32 %v1132_v5, %v474_v29 }
  0xfb   : > { %v645_v34 = vpack.c.bf16 %v632_v19, %v631_v18  ;;  %v492_v40 = vmul.f32 %v1132_v5, %v475_v31  ;;  %v525_v41 = vmul.f32 %v1134_v6, %v508_v32  ;;  %v526_v42 = vmul.f32 %v1134_v6, %v509_v33 }
  0xfc   : > { %v649_v39 = vpack.c.bf16 %v640_v28, %v639_v27  ;;  %v533_v45 = vadd.f32 %v517_v36, %v483_v30  ;;  %v534_v46 = vadd.f32 %v518_v37, %v484_v35  ;;  %v567_v49 = vmul.f32 %v1143_v10, %v550_v43 }
  0xfd   : > { %v568_v50 = vmul.f32 %v1143_v10, %v551_v44  ;;  %v541_v51 = vadd.f32 %v525_v41, %v491_v38  ;;  %v542_v5 = vadd.f32 %v526_v42, %v492_v40  ;;  %v575_v55 = vmul.f32 %v1143_v10, %v558_v47 }
  0xfe   : > { %v583_v54 = vadd.f32 %v567_v49, %v533_v45  ;;  %v617_v59 = vmul.f32 %v1158_v20, %v600_v52  ;;  %v625_v1 = vmul.f32 %v1158_v20, %v608_v57  ;;  %v626_v2 = vmul.f32 %v1158_v20, %v609_v58 }
  0xff   : > { %857 = vmatmul.msk.bf16.gmra.mxu1 %vm353_vm0, %v644_v48  ;;  %v559_v48 = vld [vmem:[%s1149_s30 + $0x78] sm:$0xff]  ;;  %v584_v6 = vadd.f32 %v568_v50, %v534_v46  ;;  %v591_v61 = vadd.f32 %v575_v55, %v541_v51 }
 0x100   : > { %v576_v56 = vmul.f32 %v1143_v10, %v559_v48  ;;  %v633_v63 = vadd.f32 %v617_v59, %v583_v54 }
 0x101   : > { %v641_v3 = vadd.f32 %v625_v1, %v591_v61 }
 0x102   : > { %861 = vmatmul.msk.bf16.gmra.mxu3 %vm353_vm0, %v648_v53  ;;  %v601_v53 = vld [vmem:[%s1154_s8 + $0x38] sm:$0xff]  ;;  %v592_v62 = vadd.f32 %v576_v56, %v542_v5 }
 0x103   : > { %v618_v60 = vmul.f32 %v1158_v20, %v601_v53 }
 0x104   : > { %v642_v4 = vadd.f32 %v626_v2, %v592_v62 }
 0x105   : > { %v634_v0 = vadd.f32 %v618_v60, %v584_v6 }
 0x106   : > { %v650_v10 = vpack.c.bf16 %v642_v4, %v641_v3 }
 0x107   : > { %v646_v7 = vpack.c.bf16 %v634_v0, %v633_v63 }
 0x10f   : > { %858 = vmatmul.msk.bf16.gmra.mxu1 %vm353_vm0, %v645_v34 }
 0x112   : > { %862 = vmatmul.msk.bf16.gmra.mxu3 %vm353_vm0, %v649_v39 }
 0x11f   : > { %859 = vmatmul.msk.bf16.gmra.mxu1 %vm353_vm0, %v646_v7 }
 0x122   : > { %863 = vmatmul.msk.bf16.gmra.mxu3 %vm353_vm0, %v650_v10 }
 0x16c   : > { %v694_v20 = vpop.f32.mrf.mxu1 }
 0x16d   : > { %v695_v9 = vadd.f32 %v902_v8, %v694_v20 }
 0x16f   : > { %734 = vst.msk [vmem:[%s1292_s13] sm:$0xff] %vm353_vm0, %v695_v9 }
 0x174   : > { %v696_v12 = vpop.f32.mrf.mxu1 }
 0x175   : > { %v714_v11 = vpop.f32.mrf.mxu3  ;;  %v697_v14 = vadd.f32 %v902_v8, %v696_v12 }
 0x176   : > { %v715_v13 = vadd.f32 %v902_v8, %v714_v11 }
 0x177   : > { %735 = vst.msk [vmem:[%s1292_s13 + $0x8] sm:$0xff] %vm353_vm0, %v697_v14 }
 0x178   : > { %742 = vst.msk [vmem:[%s1292_s13 + $0x40] sm:$0xff] %vm353_vm0, %v715_v13 }
 0x17c   : > { %v699_v16 = vpop.f32.mrf.mxu1 }
 0x17d   : > { %v716_v15 = vpop.f32.mrf.mxu3  ;;  %v700_v18 = vadd.f32 %v902_v8, %v699_v16 }
 0x17e   : > { %v717_v17 = vadd.f32 %v902_v8, %v716_v15 }
 0x17f   : > { %736 = vst.msk [vmem:[%s1292_s13 + $0x10] sm:$0xff] %vm353_vm0, %v700_v18 }
 0x180   : > { %743 = vst.msk [vmem:[%s1292_s13 + $0x48] sm:$0xff] %vm353_vm0, %v717_v17 }
 0x184   : > { %v701_v21 = vpop.f32.mrf.mxu1 }
 0x185   : > { %v719_v19 = vpop.f32.mrf.mxu3  ;;  %v702_v23 = vadd.f32 %v902_v8, %v701_v21 }
 0x186   : > { %v720_v22 = vadd.f32 %v902_v8, %v719_v19 }
 0x187   : > { %737 = vst.msk [vmem:[%s1292_s13 + $0x18] sm:$0xff] %vm353_vm0, %v702_v23 }
 0x188   : > { %744 = vst.msk [vmem:[%s1292_s13 + $0x50] sm:$0xff] %vm353_vm0, %v720_v22 }
 0x18c   : > { %v704_v25 = vpop.f32.mrf.mxu1 }
 0x18d   : > { %v721_v24 = vpop.f32.mrf.mxu3  ;;  %v705_v27 = vadd.f32 %v902_v8, %v704_v25 }
 0x18e   : > { %v722_v26 = vadd.f32 %v902_v8, %v721_v24 }
 0x18f   : > { %738 = vst.msk [vmem:[%s1292_s13 + $0x20] sm:$0xff] %vm353_vm0, %v705_v27 }
 0x190   : > { %745 = vst.msk [vmem:[%s1292_s13 + $0x58] sm:$0xff] %vm353_vm0, %v722_v26 }
 0x194   : > { %v706_v29 = vpop.f32.mrf.mxu1 }
 0x195   : > { %v724_v28 = vpop.f32.mrf.mxu3  ;;  %v707_v31 = vadd.f32 %v902_v8, %v706_v29 }
 0x196   : > { %v725_v30 = vadd.f32 %v902_v8, %v724_v28 }
 0x197   : > { %739 = vst.msk [vmem:[%s1292_s13 + $0x28] sm:$0xff] %vm353_vm0, %v707_v31 }
 0x198   : > { %746 = vst.msk [vmem:[%s1292_s13 + $0x60] sm:$0xff] %vm353_vm0, %v725_v30 }
 0x19c   : > { %v709_v33 = vpop.f32.mrf.mxu1 }
 0x19d   : > { %v726_v32 = vpop.f32.mrf.mxu3  ;;  %v710_v35 = vadd.f32 %v902_v8, %v709_v33 }
 0x19e   : > { %v727_v34 = vadd.f32 %v902_v8, %v726_v32 }
 0x19f   : > { %740 = vst.msk [vmem:[%s1292_s13 + $0x30] sm:$0xff] %vm353_vm0, %v710_v35 }
 0x1a0   : > { %747 = vst.msk [vmem:[%s1292_s13 + $0x68] sm:$0xff] %vm353_vm0, %v727_v34 }
 0x1a4   : > { %v711_v37 = vpop.f32.mrf.mxu1 }
 0x1a5   : > { %v729_v36 = vpop.f32.mrf.mxu3  ;;  %v712_v39 = vadd.f32 %v902_v8, %v711_v37 }
 0x1a6   : > { %v730_v38 = vadd.f32 %v902_v8, %v729_v36 }
 0x1a7   : > { %741 = vst.msk [vmem:[%s1292_s13 + $0x38] sm:$0xff] %vm353_vm0, %v712_v39 }
 0x1a8   : > { %748 = vst.msk [vmem:[%s1292_s13 + $0x70] sm:$0xff] %vm353_vm0, %v730_v38 }
 0x1ad   : > { %v731_v40 = vpop.f32.mrf.mxu3 }
 0x1ae   : > { %v732_v41 = vadd.f32 %v902_v8, %v731_v40 }
 0x1b0   : > { %749 = vst.msk [vmem:[%s1292_s13 + $0x78] sm:$0xff] %vm353_vm0, %v732_v41 }
 0x1b1 PF: > { %s19_s24 = sadd.s32 1, %s947_s24  }
 0x1b2   : > { %p16_p7 = scmp.ge.s32.totalorder %s19_s24, 4  }
 0x1b4   :  { %18 = sbr.rel (!%p16_p7) target bundleno = 2 (0x2), region = 91 }
 0x1b9   :  { %771 = vsyncpa [#allocation4], 1 }
 0x1ba   :  { %773 = vsyncpa [#allocation4 + $0x1], 1 }
 0x1bb   :  { %774 = vsyncpa [#allocation6], 1 }

// kernel: auto_correlation_layer_forward.2
= control target key start
LH: loop header
LB: loop body
LE: loop exit
PB: predicated region body
PF: predicated region fallthrough
CT: control target
= control target key end

     0   :  { %s1592_s21 = smov 0   ;;  %s2093_s0 = inlined_call_operand.vmem [shape: f32[2,128,32], index: 0, kind: input, shape index: {}]   ;;  %s2094_s1 = inlined_call_operand.vmem [shape: f32[2,128,32], index: 1, kind: input, shape index: {}]   ;;  %s2095_s2 = inlined_call_operand.vmem [shape: f32[32,32], index: 2, kind: input, shape index: {}]   ;;  %s2096_s3 = inlined_call_operand.vmem [shape: f32[1,32], index: 3, kind: input, shape index: {}]   ;;  %s2097_s4 = inlined_call_operand.vmem [shape: f32[32,32], index: 4, kind: input, shape index: {}]   ;;  %s2098_s5 = inlined_call_operand.vmem [shape: f32[1,32], index: 5, kind: input, shape index: {}]   ;;  %s2099_s6 = inlined_call_operand.vmem [shape: f32[2,1,128], index: 6, kind: output, shape index: {}]  }
   0x1 LB: > { %s1480_s22 = sadd.s32 4294967295, %s1548_s21   ;;  %p1484_p0 = scmp.ge.s32.totalorder %s1548_s21, 1  ;;  %s1548_s21 = sphi %s1592_s21, %s16_s21  }
   0x2   : > { %p222_p1 = scmp.lt.s32.totalorder %s1548_s21, 3 }
   0x4   : > { %p223_p2 = pnand %p1484_p0, %p222_p1 }
   0x5   : > { %p255_p3 = scmp.lt.s32.totalorder (!%p223_p2), %s1480_s22, 1  ;;  %s1550_s28 = smov (!%p223_p2), 127  }
   0x6   : > { %226 = sbr.rel (%p223_p2) target bundleno = 1284 (0x504), region = 44  ;;  %s1551_s29 = smov (!%p223_p2), 126  }
   0x7   : > { %s1552_s30 = smov (!%p223_p2), 124   ;;  %s1554_s8 = smov (!%p223_p2), 112  }
   0x8   : > { %s1555_s9 = smov (!%p223_p2), 96  }
   0xb   : > { %v295_v0 = vld [vmem:[%s2095_s2 + $0x10] sm:$0xff]  ;;  %v296_v1 = vld [vmem:[%s2095_s2 + $0x18] sm:$0xff]  ;;  %v293_v2 = vld [vmem:[%s2095_s2] sm:$0xff]  ;;  %s2101_s22 = smov (!%p255_p3, %s1480_s22), 1  ;;  %vm303_vm0 = vcmask 261120  }
   0xc   : > { %v298_v3 = vpack.c.bf16 %v296_v1, %v295_v0  ;;  %v294_v4 = vld [vmem:[%s2095_s2 + $0x8] sm:$0xff]  ;;  %s1515_s7 = sshll.u32 %s2101_s22, 7  ;;  %v403_v18 = vld [vmem:[%s2097_s4 + $0x10] sm:$0xff]  ;;  %v404_v19 = vld [vmem:[%s2097_s4 + $0x18] sm:$0xff]  ;;  %s267_s13 = scalar_lea.vmem %s2099_s6, %s2101_s22 }
   0xd   : > { %v297_v5 = vpack.c.bf16 %v294_v4, %v293_v2  ;;  %s1618_s10 = scalar_lea.vmem %s2093_s0, %s1515_s7  ;;  %s1640_s17 = scalar_lea.vmem %s2094_s1, %s1515_s7  ;;  %v406_v20 = vpack.c.bf16 %v404_v19, %v403_v18  ;;  %v401_v21 = vld [vmem:[%s2097_s4] sm:$0xff]  ;;  %v402_v22 = vld [vmem:[%s2097_s4 + $0x8] sm:$0xff] }
   0xe   : > { %334 = vmatpush.bf16.msra.mxu0 %v298_v3  ;;  %v269_v6 = vld [vmem:[%s1618_s10] sm:$0xff]  ;;  %v270_v7 = vld [vmem:[%s1618_s10 + $0x8] sm:$0xff]  ;;  %v271_v9 = vld [vmem:[%s1618_s10 + $0x10] sm:$0xff]  ;;  %v405_v23 = vpack.c.bf16 %v402_v22, %v401_v21  ;;  %s1553_s7 = smov 120  }
   0xf   : > { %v285_v8 = vpack.c.bf16 %v270_v7, %v269_v6  ;;  %v272_v10 = vld [vmem:[%s1618_s10 + $0x18] sm:$0xff]  ;;  %v273_v12 = vld [vmem:[%s1618_s10 + $0x20] sm:$0xff]  ;;  %v274_v13 = vld [vmem:[%s1618_s10 + $0x28] sm:$0xff]  ;;  %441 = vmatpush.bf16.msra.mxu1 %v406_v20 }
  0x10   : > { %v286_v11 = vpack.c.bf16 %v272_v10, %v271_v9  ;;  %v287_v14 = vpack.c.bf16 %v274_v13, %v273_v12  ;;  %v275_v15 = vld [vmem:[%s1618_s10 + $0x30] sm:$0xff]  ;;  %v276_v16 = vld [vmem:[%s1618_s10 + $0x38] sm:$0xff]  ;;  %v377_v24 = vld [vmem:[%s1640_s17] sm:$0xff] }
  0x11   : > { %v288_v17 = vpack.c.bf16 %v276_v16, %v275_v15  ;;  %v378_v25 = vld [vmem:[%s1640_s17 + $0x8] sm:$0xff]  ;;  %v277_v27 = vld [vmem:[%s1618_s10 + $0x40] sm:$0xff]  ;;  %v379_v30 = vld [vmem:[%s1640_s17 + $0x10] sm:$0xff] }
  0x12   : > { %335 = vmatpush.bf16.msra.mxu0 %v297_v5  ;;  %v393_v26 = vpack.c.bf16 %v378_v25, %v377_v24  ;;  %v278_v28 = vld [vmem:[%s1618_s10 + $0x48] sm:$0xff]  ;;  %v380_v31 = vld [vmem:[%s1640_s17 + $0x18] sm:$0xff]  ;;  %v279_v33 = vld [vmem:[%s1618_s10 + $0x50] sm:$0xff] }
  0x13   : > { %442 = vmatpush.bf16.msra.mxu1 %v405_v23  ;;  %v289_v29 = vpack.c.bf16 %v278_v28, %v277_v27  ;;  %v394_v32 = vpack.c.bf16 %v380_v31, %v379_v30  ;;  %v280_v34 = vld [vmem:[%s1618_s10 + $0x58] sm:$0xff]  ;;  %v381_v36 = vld [vmem:[%s1640_s17 + $0x20] sm:$0xff]  ;;  %v382_v37 = vld [vmem:[%s1640_s17 + $0x28] sm:$0xff] }
  0x14   : > { %v290_v35 = vpack.c.bf16 %v280_v34, %v279_v33  ;;  %v395_v38 = vpack.c.bf16 %v382_v37, %v381_v36  ;;  %v281_v39 = vld [vmem:[%s1618_s10 + $0x60] sm:$0xff]  ;;  %v282_v40 = vld [vmem:[%s1618_s10 + $0x68] sm:$0xff]  ;;  %v383_v42 = vld [vmem:[%s1640_s17 + $0x30] sm:$0xff] }
  0x15   : > { %1489 = vmatmul.msk.bf16.vlgmr.msra.gmra.mxu0 %vm303_vm0, %v285_v8  ;;  %v291_v41 = vpack.c.bf16 %v282_v40, %v281_v39  ;;  %v384_v43 = vld [vmem:[%s1640_s17 + $0x38] sm:$0xff]  ;;  %v283_v45 = vld [vmem:[%s1618_s10 + $0x70] sm:$0xff]  ;;  %v385_v48 = vld [vmem:[%s1640_s17 + $0x40] sm:$0xff] }
  0x16   : > { %1497 = vmatmul.msk.bf16.vlgmr.msra.gmra.mxu1 %vm303_vm0, %v393_v26  ;;  %v396_v44 = vpack.c.bf16 %v384_v43, %v383_v42  ;;  %v284_v46 = vld [vmem:[%s1618_s10 + $0x78] sm:$0xff]  ;;  %v386_v49 = vld [vmem:[%s1640_s17 + $0x48] sm:$0xff]  ;;  %v1679_v52 = vld [vmem:[%s2096_s3] ss:$0 sm:$0xff]  ;;  %s1556_s10 = smov 64  }
  0x17   : > { %v292_v47 = vpack.c.bf16 %v284_v46, %v283_v45  ;;  %v397_v50 = vpack.c.bf16 %v386_v49, %v385_v48  ;;  %v387_v54 = vld [vmem:[%s1640_s17 + $0x50] sm:$0xff]  ;;  %v388_v55 = vld [vmem:[%s1640_s17 + $0x58] sm:$0xff]  ;;  %v389_v62 = vld [vmem:[%s1640_s17 + $0x60] sm:$0xff] }
  0x18   : > { %v398_v58 = vpack.c.bf16 %v388_v55, %v387_v54  ;;  %v390_v63 = vld [vmem:[%s1640_s17 + $0x68] sm:$0xff]  ;;  %v391_v6 = vld [vmem:[%s1640_s17 + $0x70] sm:$0xff]  ;;  %v392_v7 = vld [vmem:[%s1640_s17 + $0x78] sm:$0xff] }
  0x19   : > { %v399_v2 = vpack.c.bf16 %v390_v63, %v389_v62  ;;  %v400_v10 = vpack.c.bf16 %v392_v7, %v391_v6 }
  0x25   : > { %1490 = vmatmul.msk.bf16.gmra.mxu0 %vm303_vm0, %v286_v11 }
  0x26   : > { %1498 = vmatmul.msk.bf16.gmra.mxu1 %vm303_vm0, %v394_v32 }
  0x35   : > { %1491 = vmatmul.msk.bf16.gmra.mxu0 %vm303_vm0, %v287_v14 }
  0x36   : > { %1499 = vmatmul.msk.bf16.gmra.mxu1 %vm303_vm0, %v395_v38 }
  0x45   : > { %1492 = vmatmul.msk.bf16.gmra.mxu0 %vm303_vm0, %v288_v17  ;;  %v1719_v17 = vld [vmem:[%s2098_s5] ss:$0 sm:$0xff] }
  0x46   : > { %1500 = vmatmul.msk.bf16.gmra.mxu1 %vm303_vm0, %v396_v44 }
  0x55   : > { %1493 = vmatmul.msk.bf16.gmra.mxu0 %vm303_vm0, %v289_v29 }
  0x56   : > { %1501 = vmatmul.msk.bf16.gmra.mxu1 %vm303_vm0, %v397_v50 }
  0x65   : > { %1494 = vmatmul.msk.bf16.gmra.mxu0 %vm303_vm0, %v290_v35 }
  0x66   : > { %1502 = vmatmul.msk.bf16.gmra.mxu1 %vm303_vm0, %v398_v58 }
  0x75   : > { %1495 = vmatmul.msk.bf16.gmra.mxu0 %vm303_vm0, %v291_v41 }
  0x76   : > { %1503 = vmatmul.msk.bf16.gmra.mxu1 %vm303_vm0, %v399_v2 }
  0x85   : > { %1496 = vmatmul.msk.bf16.gmra.mxu0 %vm303_vm0, %v292_v47 }
  0x86   : > { %1504 = vmatmul.msk.bf16.gmra.mxu1 %vm303_vm0, %v400_v10 }
  0x92   : > { %v337_v51 = vpop.f32.mrf.mxu0 }
  0x93   : > { %v1684_v56 = vadd.f32 %v1679_v52, %v337_v51  ;;  %v444_v14 = vpop.f32.mrf.mxu1 }
  0x94   : > { %v1722_v19 = vadd.f32 %v1719_v17, %v444_v14 }
  0x9a   : > { %v339_v53 = vpop.f32.mrf.mxu0 }
  0x9b   : > { %v1687_v57 = vadd.f32 %v1679_v52, %v339_v53  ;;  %v446_v21 = vpop.f32.mrf.mxu1 }
  0x9c   : > { %v1725_v22 = vadd.f32 %v1719_v17, %v446_v21 }
  0x9d   : > { %v492_v59 = vpack.c.bf16 %v1687_v57, %v1684_v56 }
  0x9e   : > { %v484_v23 = vpack.c.bf16 %v1725_v22, %v1722_v19 }
  0xa2   : > { %v342_v60 = vpop.f32.mrf.mxu0 }
  0xa3   : > { %v1695_v0 = vadd.f32 %v1679_v52, %v342_v60  ;;  %v449_v25 = vpop.f32.mrf.mxu1 }
  0xa4   : > { %v1732_v29 = vadd.f32 %v1719_v17, %v449_v25 }
  0xaa   : > { %v344_v61 = vpop.f32.mrf.mxu0 }
  0xab   : > { %v1698_v1 = vadd.f32 %v1679_v52, %v344_v61  ;;  %v451_v31 = vpop.f32.mrf.mxu1 }
  0xac   : > { %v1735_v32 = vadd.f32 %v1719_v17, %v451_v31 }
  0xad   : > { %v493_v3 = vpack.c.bf16 %v1698_v1, %v1695_v0 }
  0xae   : > { %v485_v33 = vpack.c.bf16 %v1735_v32, %v1732_v29 }
  0xb2   : > { %v347_v4 = vpop.f32.mrf.mxu0 }
  0xb3   : > { %v1706_v8 = vadd.f32 %v1679_v52, %v347_v4  ;;  %v454_v35 = vpop.f32.mrf.mxu1 }
  0xb4   : > { %v1740_v36 = vadd.f32 %v1719_v17, %v454_v35 }
  0xba   : > { %v349_v5 = vpop.f32.mrf.mxu0 }
  0xbb   : > { %v1709_v9 = vadd.f32 %v1679_v52, %v349_v5  ;;  %v456_v38 = vpop.f32.mrf.mxu1 }
  0xbc   : > { %v1743_v39 = vadd.f32 %v1719_v17, %v456_v38  ;;  %v597_v38 = vlaneseq }
  0xbd   : > { %v494_v11 = vpack.c.bf16 %v1709_v9, %v1706_v8 }
  0xbe   : > { %v486_v40 = vpack.c.bf16 %v1743_v39, %v1740_v36  ;;  %v1832_v39 = vshrl.u32 %v597_v38, 7 }
  0xc2   : > { %v352_v12 = vpop.f32.mrf.mxu0 }
  0xc3   : > { %v353_v15 = vadd.f32 %v1679_v52, %v352_v12  ;;  %v459_v42 = vpop.f32.mrf.mxu1 }
  0xc4   : > { %v1748_v43 = vadd.f32 %v1719_v17, %v459_v42 }
  0xca   : > { %v354_v13 = vpop.f32.mrf.mxu0 }
  0xcb   : > { %v355_v16 = vadd.f32 %v1679_v52, %v354_v13  ;;  %v461_v45 = vpop.f32.mrf.mxu1 }
  0xcc   : > { %v1751_v46 = vadd.f32 %v1719_v17, %v461_v45 }
  0xcd   : > { %v495_v18 = vpack.c.bf16 %v355_v16, %v353_v15  ;;  %v531_v15 = vsel %vm303_vm0, %v494_v11, 0  ;;  %v528_v16 = vsel %vm303_vm0, %v493_v3, 0 }
  0xce   : > { %v487_v47 = vpack.c.bf16 %v1751_v46, %v1748_v43 }
  0xcf   : > { %v534_v13 = vsel %vm303_vm0, %v495_v18, 0  ;;  %v525_v18 = vsel %vm303_vm0, %v492_v59, 0 }
  0xd2   : > { %v357_v20 = vpop.f32.mrf.mxu0 }
  0xd3   : > { %v358_v26 = vadd.f32 %v1679_v52, %v357_v20  ;;  %v464_v49 = vpop.f32.mrf.mxu1 }
  0xd4   : > { %v465_v53 = vadd.f32 %v1719_v17, %v464_v49 }
  0xda   : > { %v359_v24 = vpop.f32.mrf.mxu0 }
  0xdb   : > { %v360_v27 = vadd.f32 %v1679_v52, %v359_v24  ;;  %v466_v61 = vpop.f32.mrf.mxu1 }
  0xdc   : > { %v467_v63 = vadd.f32 %v1719_v17, %v466_v61 }
  0xdd   : > { %v496_v28 = vpack.c.bf16 %v360_v27, %v358_v26 }
  0xde   : > { %v488_v2 = vpack.c.bf16 %v467_v63, %v465_v53  ;;  %v1857_v53 = vadd.s32 24, %v1832_v39 }
  0xdf   : > { %v537_v12 = vsel %vm303_vm0, %v496_v28, 0 }
  0xe0   : > { %v617_v61 = vand.u32 1, %v1857_v53  ;;  %v729_v38 = vand.u32 2, %v1857_v53 }
  0xe2   : > { %v362_v30 = vpop.f32.mrf.mxu0  ;;  %vm633_vm6 = vcmp.ne.s32.totalorder %v617_v61, 0 }
  0xe3   : > { %v363_v6 = vadd.f32 %v1679_v52, %v362_v30  ;;  %v469_v14 = vpop.f32.mrf.mxu1 }
  0xe4   : > { %v470_v9 = vadd.f32 %v1719_v17, %v469_v14 }
  0xea   : > { %v364_v34 = vpop.f32.mrf.mxu0 }
  0xeb   : > { %v365_v4 = vadd.f32 %v1679_v52, %v364_v34 }
  0xed   : > { %v497_v7 = vpack.c.bf16 %v365_v4, %v363_v6 }
  0xef   : > { %v540_v10 = vsel %vm303_vm0, %v497_v7, 0  ;;  %v1878_v7 = vadd.s32 40, %v1832_v39 }
  0xf2   : > { %v367_v37 = vpop.f32.mrf.mxu0 }
  0xf3   : > { %v368_v60 = vadd.f32 %v1679_v52, %v367_v37 }
  0xfa   : > { %v369_v41 = vpop.f32.mrf.mxu0 }
  0xfb   : > { %v370_v55 = vadd.f32 %v1679_v52, %v369_v41 }
  0xfd   : > { %v498_v62 = vpack.c.bf16 %v370_v55, %v368_v60 }
  0xff   : > { %v543_v5 = vsel %vm303_vm0, %v498_v62, 0 }
 0x102   : > { %v372_v44 = vpop.f32.mrf.mxu0 }
 0x103   : > { %v373_v50 = vadd.f32 %v1679_v52, %v372_v44  ;;  %v1840_v44 = vadd.s32 120, %v1832_v39 }
 0x105   : > { %v629_v45 = vand.u32 1, %v1840_v44 }
 0x107   : > { %vm645_vm2 = vcmp.ne.s32.totalorder %v629_v45, 0 }
 0x10a   : > { %v374_v48 = vpop.f32.mrf.mxu0 }
 0x10b   : > { %v375_v51 = vadd.f32 %v1679_v52, %v374_v48  ;;  %v471_v52 = vpop.f32.mrf.mxu1  ;;  %v1845_v48 = vadd.s32 56, %v1832_v39 }
 0x10c   : > { %v472_v11 = vadd.f32 %v1719_v17, %v471_v52 }
 0x10d   : > { %v499_v54 = vpack.c.bf16 %v375_v51, %v373_v50  ;;  %v621_v49 = vand.u32 1, %v1845_v48  ;;  %v1851_v50 = vadd.s32 104, %v1832_v39  ;;  %v1854_v51 = vadd.s32 112, %v1832_v39 }
 0x10e   : > { %v489_v20 = vpack.c.bf16 %v472_v11, %v470_v9 }
 0x10f   : > { %v546_v58 = vsel %vm303_vm0, %v499_v54, 0  ;;  %vm637_vm3 = vcmp.ne.s32.totalorder %v621_v49, 0  ;;  %v628_v60 = vand.u32 1, %v1854_v51 }
 0x110   : > { %548 = vmatpush.bf16.xpose.msra.mxu2 %v546_v58  ;;  %1517 = vmatpush.bf16.xpose.msra.mxu3 %v546_v58  ;;  %v627_v58 = vand.u32 1, %v1851_v50 }
 0x111   : > { %vm644_vm5 = vcmp.ne.s32.totalorder %v628_v60, 0 }
 0x112   : > { %vm643_vm4 = vcmp.ne.s32.totalorder %v627_v58, 0  ;;  %v1967_v58 = vadd.s32 32, %v1832_v39 }
 0x113   : > { %v474_v8 = vpop.f32.mrf.mxu1 }
 0x114   : > { %v475_v56 = vadd.f32 %v1719_v17, %v474_v8 }
 0x118   : > { %549 = vmatpush.bf16.xpose.msra.mxu2 %v543_v5  ;;  %1518 = vmatpush.bf16.xpose.msra.mxu3 %v543_v5 }
 0x11b   : > { %v476_v0 = vpop.f32.mrf.mxu1 }
 0x11c   : > { %v477_v57 = vadd.f32 %v1719_v17, %v476_v0  ;;  %v1911_v0 = vadd.s32 72, %v1832_v39 }
 0x11e   : > { %v490_v1 = vpack.c.bf16 %v477_v57, %v475_v56 }
 0x120   : > { %550 = vmatpush.bf16.xpose.msra.mxu2 %v540_v10  ;;  %1519 = vmatpush.bf16.xpose.msra.mxu3 %v540_v10  ;;  %v619_v10 = vand.u32 1, %v1878_v7 }
 0x122   : > { %vm635_vm7 = vcmp.ne.s32.totalorder %v619_v10, 0 }
 0x123   : > { %v479_v59 = vpop.f32.mrf.mxu1 }
 0x124   : > { %v480_v19 = vadd.f32 %v1719_v17, %v479_v59 }
 0x128   : > { %551 = vmatpush.bf16.xpose.msra.mxu2 %v537_v12  ;;  %1520 = vmatpush.bf16.xpose.msra.mxu3 %v537_v12 }
 0x12b   : > { %v481_v3 = vpop.f32.mrf.mxu1 }
 0x12c   : > { %v482_v21 = vadd.f32 %v1719_v17, %v481_v3 }
 0x12e   : > { %v491_v22 = vpack.c.bf16 %v482_v21, %v480_v19  ;;  %v1921_v19 = vadd.s32 96, %v1832_v39 }
 0x130   : > { %552 = vmatpush.bf16.xpose.msra.mxu2 %v534_v13  ;;  %1521 = vmatpush.bf16.xpose.msra.mxu3 %v534_v13 }
 0x138   : > { %553 = vmatpush.bf16.xpose.msra.mxu2 %v531_v15  ;;  %1522 = vmatpush.bf16.xpose.msra.mxu3 %v531_v15 }
 0x140   : > { %554 = vmatpush.bf16.xpose.msra.mxu2 %v528_v16  ;;  %1523 = vmatpush.bf16.xpose.msra.mxu3 %v528_v16  ;;  %v741_v16 = vand.u32 2, %v1840_v44 }
 0x142   : > { %vm757_vm9 = vcmp.ne.s32.totalorder %v741_v16, 0 }
 0x148   : > { %555 = vmatpush.bf16.xpose.msra.mxu2 %v525_v18  ;;  %1524 = vmatpush.bf16.xpose.msra.mxu3 %v525_v18  ;;  %v1900_v18 = vadd.s32 48, %v1832_v39 }
 0x14a   : > { %v620_v11 = vand.u32 1, %v1900_v18 }
 0x14c   : > { %vm636_vm10 = vcmp.ne.s32.totalorder %v620_v11, 0 }
 0x14f   : > { %1505 = vmatmul.msk.bf16.vlgmr.msra.gmra.mxu2 %vm303_vm0, %v484_v23  ;;  %1510 = vmatmul.msk.bf16.vlgmr.msra.gmra.mxu3 %vm303_vm0, %v489_v20  ;;  %v1908_v20 = vadd.s32 80, %v1832_v39 }
 0x151   : > { %v624_v59 = vand.u32 1, %v1908_v20  ;;  %v736_v10 = vand.u32 2, %v1908_v20 }
 0x153   : > { %vm640_vm11 = vcmp.ne.s32.totalorder %v624_v59, 0  ;;  %v731_v59 = vand.u32 2, %v1878_v7 }
 0x15f   : > { %1506 = vmatmul.msk.bf16.gmra.mxu2 %vm303_vm0, %v485_v33  ;;  %1511 = vmatmul.msk.bf16.gmra.mxu3 %vm303_vm0, %v490_v1  ;;  %v623_v1 = vand.u32 1, %v1911_v0 }
 0x161   : > { %vm639_vm12 = vcmp.ne.s32.totalorder %v623_v1, 0 }
 0x16f   : > { %1507 = vmatmul.msk.bf16.gmra.mxu2 %vm303_vm0, %v486_v40  ;;  %1512 = vmatmul.msk.bf16.gmra.mxu3 %vm303_vm0, %v491_v22  ;;  %v1835_v40 = vadd.s32 88, %v1832_v39 }
 0x171   : > { %v625_v41 = vand.u32 1, %v1835_v40  ;;  %v737_v14 = vand.u32 2, %v1835_v40 }
 0x173   : > { %vm641_vm1 = vcmp.ne.s32.totalorder %v625_v41, 0  ;;  %vm753_vm8 = vcmp.ne.s32.totalorder %v737_v14, 0  ;;  %v1949_v41 = vadd.s32 8, %v1832_v39 }
 0x17f   : > { %1508 = vmatmul.msk.bf16.gmra.mxu2 %vm303_vm0, %v487_v47 }
 0x18f   : > { %1509 = vmatmul.msk.bf16.gmra.mxu2 %vm303_vm0, %v488_v2 }
 0x1d2   : > { %v1803_v23 = vpop.f32.mrf.mxu2  ;;  %v1805_v24 = vpop.f32.mrf.mxu3 }
 0x1da   : > { %v1807_v25 = vpop.f32.mrf.mxu2  ;;  %v584_v26 = vpop.f32.mrf.mxu3 }
 0x1db   : > { %668 = vrot.lane.b32.xlu1 %v584_v26, %s1550_s28 }
 0x1e2   : > { %v1810_v17 = vpop.f32.mrf.mxu2  ;;  %v1812_v27 = vpop.f32.mrf.mxu3 }
 0x1ea   : > { %v564_v28 = vpop.f32.mrf.mxu2  ;;  %v589_v29 = vpop.f32.mrf.mxu3 }
 0x1eb   : > { %672 = vrot.lane.b32.xlu1 %v589_v29, %s1550_s28 }
 0x1f2   : > { %v1815_v30 = vpop.f32.mrf.mxu2  ;;  %v592_v31 = vpop.f32.mrf.mxu3 }
 0x1f3   : > { %674 = vrot.lane.b32.xlu2 %v592_v31, %s1550_s28 }
 0x1fa   : > { %v569_v32 = vpop.f32.mrf.mxu2  ;;  %v594_v33 = vpop.f32.mrf.mxu3 }
 0x1fb   : > { %676 = vrot.lane.b32.xlu0 %v594_v33, %s1550_s28  ;;  %656 = vrot.lane.b32.xlu1 %v569_v32, %s1550_s28 }
 0x202   : > { %v1820_v34 = vpop.f32.mrf.mxu2 }
 0x20a   : > { %v574_v35 = vpop.f32.mrf.mxu2 }
 0x20b   : > { %660 = vrot.lane.b32.xlu0 %v574_v35, %s1550_s28 }
 0x212   : > { %v1823_v36 = vpop.f32.mrf.mxu2 }
 0x213   : > { %652 = vrot.lane.b32.xlu0 %v564_v28, %s1550_s28 }
 0x21a   : > { %v1826_v37 = vpop.f32.mrf.mxu2 }
 0x21b   : > { %664 = vrot.lane.b32.xlu1 %v1826_v37, %s1550_s28 }
 0x223   : > { %670 = vrot.lane.b32.xlu1 %v1812_v27, %s1550_s28 }
 0x24d   : > { %v669_v42 = vpop.permute.xlu1 %668  ;;  %v675_v62 = vpop.permute.xlu2 %674 }
 0x24e   : > { %v721_v43 = vsel %vm641_vm1, %v669_v42, %v584_v26  ;;  %v1868_v5 = vsel %vm644_vm5, %v675_v62, %v592_v31  ;;  %v1952_v42 = vadd.s32 16, %v1832_v39  ;;  %vm745_vm1 = vcmp.ne.s32.totalorder %v729_v38, 0 }
 0x24f   : > { %780 = vrot.lane.b32.xlu0 %v721_v43, %s1551_s29 }
 0x25d   : > { %v673_v63 = vpop.permute.xlu1 %672 }
 0x25e   : > { %v723_v4 = vsel %vm643_vm4, %v673_v63, %v589_v29  ;;  %v626_v29 = vand.u32 1, %v1921_v19  ;;  %v618_v63 = vand.u32 1, %v1967_v58 }
 0x260   : > { %vm642_vm14 = vcmp.ne.s32.totalorder %v626_v29, 0  ;;  %vm634_vm4 = vcmp.ne.s32.totalorder %v618_v63, 0  ;;  %v735_v29 = vand.u32 2, %v1911_v0  ;;  %v847_v63 = vand.u32 4, %v1911_v0 }
 0x261   : > { %v728_v0 = vand.u32 2, %v1952_v42 }
 0x26d   : > { %v677_v46 = vpop.permute.xlu0 %676  ;;  %v657_v12 = vpop.permute.xlu1 %656 }
 0x26e   : > { %v725_v47 = vsel %vm645_vm2, %v677_v46, %v594_v33  ;;  %v1885_v13 = vsel %vm635_vm7, %v657_v12, %v569_v32 }
 0x26f   : > { %788 = vrot.lane.b32.xlu2 %v725_v47, %s1551_s29 }
 0x277   : > { %658 = vrot.lane.b32.xlu2 %v1820_v34, %s1550_s28 }
 0x27d   : > { %v661_v54 = vpop.permute.xlu0 %660 }
 0x27e   : > { %v1859_v55 = vsel %vm637_vm3, %v661_v54, %v574_v35  ;;  %v615_v54 = vand.u32 1, %v1949_v41 }
 0x27f   : > { %666 = vrot.lane.b32.xlu2 %v1805_v24, %s1550_s28  ;;  %772 = vrot.lane.b32.xlu0 %v1859_v55, %s1551_s29 }
 0x280   : > { %vm631_vm2 = vcmp.ne.s32.totalorder %v615_v54, 0 }
 0x285   : > { %v653_v2 = vpop.permute.xlu0 %652 }
 0x286   : > { %v1870_v6 = vsel %vm633_vm6, %v653_v2, %v564_v28  ;;  %v739_v28 = vand.u32 2, %v1851_v50  ;;  %vm752_vm6 = vcmp.ne.s32.totalorder %v736_v10, 0  ;;  %v850_v10 = vand.u32 4, %v1921_v19 }
 0x287   : > { %784 = vrot.lane.b32.xlu2 %v723_v4, %s1551_s29  ;;  %786 = vrot.lane.b32.xlu0 %v1868_v5, %s1551_s29 }
 0x288   : > { %764 = vrot.lane.b32.xlu1 %v1870_v6, %s1551_s29  ;;  %vm755_vm13 = vcmp.ne.s32.totalorder %v739_v28, 0  ;;  %v849_v28 = vand.u32 4, %v1835_v40  ;;  %v841_v40 = vand.u32 4, %v1857_v53  ;;  %v852_v53 = vand.u32 4, %v1854_v51 }
 0x28d   : > { %v665_v3 = vpop.permute.xlu1 %664 }
 0x28e   : > { %v1925_v26 = vsel %vm639_vm12, %v665_v3, %v1826_v37  ;;  %vm865_vm12 = vcmp.ne.s32.totalorder %v849_v28, 0 }
 0x28f   : > { %648 = vrot.lane.b32.xlu2 %v1807_v25, %s1550_s28  ;;  %650 = vrot.lane.b32.xlu0 %v1810_v17, %s1550_s28 }
 0x295   : > { %v671_v31 = vpop.permute.xlu1 %670 }
 0x297   : > { %654 = vrot.lane.b32.xlu2 %v1815_v30, %s1550_s28  ;;  %768 = vrot.lane.b32.xlu0 %v1885_v13, %s1551_s29 }
 0x29f   : > { %662 = vrot.lane.b32.xlu2 %v1823_v36, %s1550_s28 }
 0x2c1   : > { %v781_v15 = vpop.permute.xlu0 %780 }
 0x2c2   : > { %v1894_v52 = vsel %vm753_vm8, %v781_v15, %v721_v43  ;;  %v853_v15 = vand.u32 4, %v1840_v44 }
 0x2c3   : > { %892 = vrot.lane.b32.xlu0 %v1894_v52, %s1552_s30 }
 0x2c4   : > { %vm869_vm8 = vcmp.ne.s32.totalorder %v853_v15, 0  ;;  %v843_v15 = vand.u32 4, %v1878_v7 }
 0x2c9   : > { %v789_v8 = vpop.permute.xlu2 %788 }
 0x2ca   : > { %v1902_v9 = vsel %vm757_vm9, %v789_v8, %v725_v47 }
 0x2cb   : > { %900 = vrot.lane.b32.xlu1 %v1902_v9, %s1552_s30 }
 0x2d1   : > { %v659_v56 = vpop.permute.xlu2 %658 }
 0x2d2   : > { %v1914_v57 = vsel %vm636_vm10, %v659_v56, %v1820_v34  ;;  %v1933_v34 = vsel %vm642_vm14, %v671_v31, %v1812_v27  ;;  %v740_v27 = vand.u32 2, %v1854_v51  ;;  %v614_v56 = vand.u32 1, %v1832_v39 }
 0x2d3   : > { %770 = vrot.lane.b32.xlu1 %v1914_v57, %s1551_s29  ;;  %vm747_vm10 = vcmp.ne.s32.totalorder %v731_v59, 0  ;;  %v726_v59 = vand.u32 2, %v1832_v39 }
 0x2d4   : > { %vm756_vm0 = vcmp.ne.s32.totalorder %v740_v27, 0  ;;  %vm630_vm9 = vcmp.ne.s32.totalorder %v614_v56, 0 }
 0x2d9   : > { %v667_v21 = vpop.permute.xlu2 %666 }
 0x2da   : > { %v720_v22 = vsel %vm640_vm11, %v667_v21, %v1805_v24  ;;  %v733_v24 = vand.u32 2, %v1845_v48 }
 0x2db   : > { %778 = vrot.lane.b32.xlu2 %v720_v22, %s1551_s29  ;;  %776 = vrot.lane.b32.xlu1 %v1925_v26, %s1551_s29 }
 0x2dc   : > { %vm749_vm15 = vcmp.ne.s32.totalorder %v733_v24, 0 }
 0x2e1   : > { %v785_v32 = vpop.permute.xlu2 %784 }
 0x2e2   : > { %v835_v33 = vsel %vm755_vm13, %v785_v32, %v723_v4  ;;  %v1981_v4 = vadd.s32 64, %v1832_v39  ;;  %vm751_vm13 = vcmp.ne.s32.totalorder %v735_v29, 0  ;;  %v738_v32 = vand.u32 2, %v1921_v19 }
 0x2e3   : > { %896 = vrot.lane.b32.xlu2 %v835_v33, %s1552_s30  ;;  %782 = vrot.lane.b32.xlu1 %v1933_v34, %s1551_s29 }
 0x2e4   : > { %vm754_vm14 = vcmp.ne.s32.totalorder %v738_v32, 0  ;;  %v846_v32 = vand.u32 4, %v1981_v4 }
 0x2e9   : > { %v649_v47 = vpop.permute.xlu2 %648 }
 0x2ea   : > { %v1970_v61 = vsel %vm631_vm2, %v649_v47, %v1807_v25  ;;  %v622_v25 = vand.u32 1, %v1981_v4 }
 0x2eb   : > { %646 = vrot.lane.b32.xlu2 %v1803_v23, %s1550_s28 }
 0x2ec   : > { %vm638_vm5 = vcmp.ne.s32.totalorder %v622_v25, 0 }
 0x2f1   : > { %v773_v35 = vpop.permute.xlu0 %772  ;;  %v655_v2 = vpop.permute.xlu2 %654 }
 0x2f2   : > { %v1942_v37 = vsel %vm749_vm15, %v773_v35, %v1859_v55  ;;  %v616_v55 = vand.u32 1, %v1952_v42  ;;  %vm857_vm15 = vcmp.ne.s32.totalorder %v841_v40, 0 }
 0x2f3   : > { %884 = vrot.lane.b32.xlu0 %v1942_v37, %s1552_s30 }
 0x2f4   : > { %vm632_vm3 = vcmp.ne.s32.totalorder %v616_v55, 0 }
 0x2f9   : > { %v787_v43 = vpop.permute.xlu0 %786 }
 0x2fa   : > { %v765_v45 = vpop.permute.xlu1 %764  ;;  %v1955_v46 = vsel %vm756_vm0, %v787_v43, %v1868_v5  ;;  %v1984_v5 = vsel %vm634_vm4, %v655_v2, %v1815_v30  ;;  %v851_v30 = vand.u32 4, %v1851_v50  ;;  %v732_v50 = vand.u32 2, %v1900_v18 }
 0x2fb   : > { %898 = vrot.lane.b32.xlu0 %v1955_v46, %s1552_s30  ;;  %v1960_v49 = vsel %vm745_vm1, %v765_v45, %v1870_v6  ;;  %vm868_vm1 = vcmp.ne.s32.totalorder %v852_v53, 0  ;;  %v727_v45 = vand.u32 2, %v1949_v41 }
 0x2fc   : > { %876 = vrot.lane.b32.xlu2 %v1960_v49, %s1552_s30  ;;  %vm867_vm7 = vcmp.ne.s32.totalorder %v851_v30, 0  ;;  %vm748_vm11 = vcmp.ne.s32.totalorder %v732_v50, 0  ;;  %v839_v50 = vand.u32 4, %v1949_v41 }
 0x2fd   : > { %vm743_vm2 = vcmp.ne.s32.totalorder %v727_v45, 0 }
 0x301   : > { %v651_v60 = vpop.permute.xlu0 %650 }
 0x302   : > { %v1973_v62 = vsel %vm632_vm3, %v651_v60, %v1810_v17  ;;  %v663_v17 = vpop.permute.xlu2 %662 }
 0x303   : > { %760 = vrot.lane.b32.xlu0 %v1970_v61, %s1551_s29  ;;  %762 = vrot.lane.b32.xlu1 %v1973_v62, %s1551_s29  ;;  %v1990_v6 = vsel %vm638_vm5, %v663_v17, %v1823_v36 }
 0x309   : > { %v769_v1 = vpop.permute.xlu0 %768 }
 0x30b   : > { %766 = vrot.lane.b32.xlu0 %v1984_v5, %s1551_s29 }
 0x313   : > { %774 = vrot.lane.b32.xlu0 %v1990_v6, %s1551_s29 }
 0x335   : > { %v779_v12 = vpop.permute.xlu2 %778  ;;  %v893_v31 = vpop.permute.xlu0 %892 }
 0x336   : > { %v1995_v14 = vsel %vm752_vm6, %v779_v12, %v720_v22  ;;  %vm863_vm6 = vcmp.ne.s32.totalorder %v847_v63, 0 }
 0x337   : > { %890 = vrot.lane.b32.xlu0 %v1995_v14, %s1552_s30 }
 0x33d   : > { %v897_v36 = vpop.permute.xlu2 %896  ;;  %v901_v16 = vpop.permute.xlu1 %900 }
 0x33e   : > { %v947_v8 = vsel %vm867_vm7, %v897_v36, %v835_v33  ;;  %v949_v11 = vsel %vm869_vm8, %v901_v16, %v1902_v9  ;;  %v2011_v9 = vsel %vm747_vm10, %v769_v1, %v1885_v13  ;;  %v945_v13 = vsel %vm865_vm12, %v893_v31, %v1894_v52 }
 0x33f   : > { %1008 = vrot.lane.b32.xlu0 %v947_v8, %s1553_s7  ;;  %1012 = vrot.lane.b32.xlu1 %v949_v11, %s1553_s7  ;;  %v845_v52 = vand.u32 4, %v1845_v48  ;;  %vm866_vm7 = vcmp.ne.s32.totalorder %v850_v10, 0  ;;  %vm744_vm8 = vcmp.ne.s32.totalorder %v728_v0, 0  ;;  %v734_v16 = vand.u32 2, %v1981_v4 }
 0x340   : > { %vm855_vm12 = vcmp.ne.s32.totalorder %v839_v50, 0 }
 0x341   : > { %vm861_vm0 = vcmp.ne.s32.totalorder %v845_v52, 0  ;;  %vm750_vm10 = vcmp.ne.s32.totalorder %v734_v16, 0 }
 0x345   : > { %v647_v44 = vpop.permute.xlu2 %646  ;;  %v771_v3 = vpop.permute.xlu1 %770 }
 0x346   : > { %v2008_v21 = vsel %vm630_vm9, %v647_v44, %v1803_v23  ;;  %v828_v22 = vsel %vm748_vm11, %v771_v3, %v1914_v57  ;;  %vm859_vm9 = vcmp.ne.s32.totalorder %v843_v15, 0  ;;  %vm742_vm11 = vcmp.ne.s32.totalorder %v726_v59, 0 }
 0x347   : > { %758 = vrot.lane.b32.xlu0 %v2008_v21, %s1551_s29  ;;  %880 = vrot.lane.b32.xlu1 %v2011_v9, %s1552_s30 }
 0x348   : > { %882 = vrot.lane.b32.xlu2 %v828_v22, %s1552_s30 }
 0x34d   : > { %v777_v23 = vpop.permute.xlu1 %776 }
 0x34e   : > { %v831_v57 = vsel %vm751_vm13, %v777_v23, %v1925_v26 }
 0x34f   : > { %1004 = vrot.lane.b32.xlu1 %v945_v13, %s1553_s7 }
 0x350   : > { %888 = vrot.lane.b32.xlu2 %v831_v57, %s1552_s30 }
 0x355   : > { %v783_v33 = vpop.permute.xlu1 %782 }
 0x356   : > { %v877_v24 = vpop.permute.xlu2 %876  ;;  %v834_v35 = vsel %vm754_vm14, %v783_v33, %v1933_v34 }
 0x357   : > { %v937_v27 = vsel %vm857_vm15, %v877_v24, %v1960_v49  ;;  %vm862_vm15 = vcmp.ne.s32.totalorder %v846_v32, 0 }
 0x358   : > { %988 = vrot.lane.b32.xlu0 %v937_v27, %s1553_s7  ;;  %894 = vrot.lane.b32.xlu2 %v834_v35, %s1552_s30 }
 0x365   : > { %v885_v26 = vpop.permute.xlu0 %884 }
 0x366   : > { %v941_v38 = vsel %vm861_vm0, %v885_v26, %v1942_v37  ;;  %v730_v37 = vand.u32 2, %v1967_v58 }
 0x367   : > { %996 = vrot.lane.b32.xlu1 %v941_v38, %s1553_s7  ;;  %v838_v38 = vand.u32 4, %v1832_v39 }
 0x368   : > { %vm746_vm3 = vcmp.ne.s32.totalorder %v730_v37, 0 }
 0x369   : > { %vm854_vm0 = vcmp.ne.s32.totalorder %v838_v38, 0 }
 0x36d   : > { %v899_v43 = vpop.permute.xlu0 %898 }
 0x36e   : > { %v948_v34 = vsel %vm868_vm1, %v899_v43, %v1955_v46  ;;  %v844_v46 = vand.u32 4, %v1900_v18 }
 0x36f   : > { %1122 = vrot.lane.b32.xlu1 %v948_v34, %s1554_s8 }
 0x370   : > { %vm860_vm4 = vcmp.ne.s32.totalorder %v844_v46, 0 }
 0x375   : > { %v761_v47 = vpop.permute.xlu0 %760  ;;  %v763_v2 = vpop.permute.xlu1 %762 }
 0x376   : > { %v823_v48 = vsel %vm743_vm2, %v761_v47, %v1970_v61  ;;  %v848_v61 = vand.u32 4, %v1908_v20 }
 0x377   : > { %872 = vrot.lane.b32.xlu1 %v823_v48, %s1552_s30 }
 0x378   : > { %vm864_vm5 = vcmp.ne.s32.totalorder %v848_v61, 0 }
 0x37d   : > { %v767_v49 = vpop.permute.xlu0 %766 }
 0x37e   : > { %v2042_v51 = vsel %vm746_vm3, %v767_v49, %v1984_v5 }
 0x37f   : > { %878 = vrot.lane.b32.xlu1 %v2042_v51, %s1552_s30 }
 0x385   : > { %v775_v54 = vpop.permute.xlu0 %774 }
 0x386   : > { %v830_v8 = vsel %vm750_vm10, %v775_v54, %v1990_v6 }
 0x3a2   : > { %v883_v55 = vpop.permute.xlu2 %882 }
 0x3a3   : > { %v940_v60 = vsel %vm860_vm4, %v883_v55, %v828_v22 }
 0x3a4   : > { %1106 = vrot.lane.b32.xlu0 %v940_v60, %s1554_s8 }
 0x3a9   : > { %v891_v5 = vpop.permute.xlu0 %890 }
 0x3aa   : > { %v889_v25 = vpop.permute.xlu2 %888  ;;  %v944_v17 = vsel %vm864_vm5, %v891_v5, %v1995_v14  ;;  %v824_v14 = vsel %vm744_vm8, %v763_v2, %v1973_v62 }
 0x3ab   : > { %1114 = vrot.lane.b32.xlu1 %v944_v17, %s1554_s8  ;;  %v943_v18 = vsel %vm863_vm6, %v889_v25, %v831_v57 }
 0x3ac   : > { %1000 = vrot.lane.b32.xlu0 %v943_v18, %s1553_s7 }
 0x3b1   : > { %v1013_v20 = vpop.permute.xlu1 %1012  ;;  %v1009_v7 = vpop.permute.xlu0 %1008 }
 0x3b2   : > { %v895_v12 = vpop.permute.xlu2 %894  ;;  %1124 = vrot.lane.b32.xlu2 %v1013_v20, %s1554_s8 }
 0x3b3   : > { %v946_v30 = vsel %vm866_vm7, %v895_v12, %v834_v35 }
 0x3b4   : > { %1230 = vrot.lane.b32.xlu0 %v946_v30, %s1555_s9 }
 0x3b9   : > { %v881_v36 = vpop.permute.xlu1 %880  ;;  %v759_v1 = vpop.permute.xlu0 %758 }
 0x3ba   : > { %874 = vrot.lane.b32.xlu2 %v824_v14, %s1552_s30  ;;  %v939_v19 = vsel %vm859_vm9, %v881_v36, %v2011_v9  ;;  %v822_v44 = vsel %vm742_vm11, %v759_v1, %v2008_v21  ;;  %v842_v9 = vand.u32 4, %v1967_v58  ;;  %v840_v21 = vand.u32 4, %v1952_v42 }
 0x3bc   : > { %vm858_vm13 = vcmp.ne.s32.totalorder %v842_v9, 0  ;;  %vm856_vm14 = vcmp.ne.s32.totalorder %v840_v21, 0 }
 0x3c1   : > { %v1005_v11 = vpop.permute.xlu1 %1004 }
 0x3c2   : > { %992 = vrot.lane.b32.xlu2 %v939_v19, %s1553_s7 }
 0x3ca   : > { %886 = vrot.lane.b32.xlu2 %v830_v8, %s1552_s30  ;;  %v989_v22 = vpop.permute.xlu0 %988 }
 0x3d2   : > { %1116 = vrot.lane.b32.xlu2 %v1005_v11, %s1554_s8 }
 0x3d9   : > { %v997_v62 = vpop.permute.xlu1 %996 }
 0x3da   : > { %1108 = vrot.lane.b32.xlu1 %v997_v62, %s1554_s8 }
 0x3e1   : > { %v1123_v56 = vpop.permute.xlu1 %1122 }
 0x3e2   : > { %1232 = vrot.lane.b32.xlu1 %v1009_v7, %s1555_s9  ;;  %1234 = vrot.lane.b32.xlu2 %v1123_v56, %s1555_s9 }
 0x3e9   : > { %v873_v6 = vpop.permute.xlu1 %872 }
 0x3ea   : > { %870 = vrot.lane.b32.xlu1 %v822_v44, %s1552_s30  ;;  %v935_v3 = vsel %vm855_vm12, %v873_v6, %v823_v48 }
 0x3eb   : > { %984 = vrot.lane.b32.xlu2 %v935_v3, %s1553_s7 }
 0x3f1   : > { %v879_v28 = vpop.permute.xlu1 %878 }
 0x3f2   : > { %1100 = vrot.lane.b32.xlu1 %v989_v22, %s1554_s8  ;;  %v938_v41 = vsel %vm858_vm13, %v879_v28, %v2042_v51 }
 0x3f3   : > { %1214 = vrot.lane.b32.xlu2 %v938_v41, %s1555_s9 }
 0x40c   : > { %v1125_v29 = vpop.permute.xlu2 %1124 }
 0x40d   : > { %1236 = vrot.lane.b32.xlu0 %v1125_v29, %s1555_s9 }
 0x414   : > { %v875_v31 = vpop.permute.xlu2 %874 }
 0x415   : > { %v936_v23 = vsel %vm856_vm14, %v875_v31, %v824_v14 }
 0x416   : > { %v1107_v13 = vpop.permute.xlu0 %1106  ;;  %1098 = vrot.lane.b32.xlu0 %v936_v23, %s1554_s8 }
 0x417   : > { %1218 = vrot.lane.b32.xlu1 %v1107_v13, %s1555_s9 }
 0x41c   : > { %v993_v58 = vpop.permute.xlu2 %992 }
 0x41d   : > { %v1115_v27 = vpop.permute.xlu1 %1114 }
 0x41e   : > { %v1001_v57 = vpop.permute.xlu0 %1000  ;;  %1216 = vrot.lane.b32.xlu0 %v993_v58, %s1555_s9 }
 0x41f   : > { %1336 = vrot.lane.b32.xlu1 %v1001_v57, %s1556_s10 }
 0x424   : > { %v887_v40 = vpop.permute.xlu2 %886 }
 0x425   : > { %v942_v33 = vsel %vm862_vm15, %v887_v40, %v830_v8 }
 0x426   : > { %v1231_v42 = vpop.permute.xlu0 %1230  ;;  %1334 = vrot.lane.b32.xlu0 %v942_v33, %s1556_s10 }
 0x427   : > { %1342 = vrot.lane.b32.xlu1 %v1231_v42, %s1556_s10 }
 0x42c   : > { %v1117_v24 = vpop.permute.xlu2 %1116 }
 0x42e   : > { %1340 = vrot.lane.b32.xlu0 %v1117_v24, %s1556_s10 }
 0x43c   : > { %v1235_v35 = vpop.permute.xlu2 %1234 }
 0x43d   : > { %1346 = vrot.lane.b32.xlu0 %v1235_v35, %s1556_s10 }
 0x445   : > { %v985_v43 = vpop.permute.xlu2 %984 }
 0x44c   : > { %v1109_v52 = vpop.permute.xlu1 %1108 }
 0x44d   : > { %1220 = vrot.lane.b32.xlu2 %v1109_v52, %s1555_s9  ;;  %v1215_v51 = vpop.permute.xlu2 %1214 }
 0x454   : > { %v1233_v26 = vpop.permute.xlu1 %1232 }
 0x455   : > { %1338 = vrot.lane.b32.xlu2 %v1115_v27, %s1556_s10 }
 0x45c   : > { %v871_v53 = vpop.permute.xlu1 %870 }
 0x45d   : > { %1344 = vrot.lane.b32.xlu2 %v1233_v26, %s1556_s10  ;;  %v934_v34 = vsel %vm854_vm0, %v871_v53, %v822_v44 }
 0x45e   : > { %v1398_v47 = vadd.f32 %v985_v43, %v934_v34 }
 0x464   : > { %v1101_v37 = vpop.permute.xlu1 %1100 }
 0x47f   : > { %v1237_v4 = vpop.permute.xlu0 %1236 }
 0x480   : > { %1348 = vrot.lane.b32.xlu1 %v1237_v4, %s1556_s10 }
 0x488   : > { %v1099_v45 = vpop.permute.xlu0 %1098 }
 0x489   : > { %v1399_v48 = vadd.f32 %v1398_v47, %v1099_v45  ;;  %v1219_v60 = vpop.permute.xlu1 %1218 }
 0x48b   : > { %v1400_v49 = vadd.f32 %v1399_v48, %v1101_v37 }
 0x48d   : > { %v1401_v54 = vadd.f32 %v1400_v49, %v1215_v51 }
 0x490   : > { %v1217_v46 = vpop.permute.xlu0 %1216 }
 0x491   : > { %v1402_v55 = vadd.f32 %v1401_v54, %v1217_v46  ;;  %v1337_v39 = vpop.permute.xlu1 %1336 }
 0x493   : > { %v1403_v63 = vadd.f32 %v1402_v55, %v1219_v60 }
 0x498   : > { %v1335_v5 = vpop.permute.xlu0 %1334 }
 0x499   : > { %v1343_v0 = vpop.permute.xlu1 %1342 }
 0x4a0   : > { %v1341_v20 = vpop.permute.xlu0 %1340 }
 0x4a7   : > { %v1221_v61 = vpop.permute.xlu2 %1220 }
 0x4a8   : > { %v1404_v2 = vadd.f32 %v1403_v63, %v1221_v61 }
 0x4aa   : > { %v1405_v25 = vadd.f32 %v1404_v2, %v1335_v5 }
 0x4ac   : > { %v1406_v18 = vadd.f32 %v1405_v25, %v1337_v39 }
 0x4af   : > { %v1339_v17 = vpop.permute.xlu2 %1338  ;;  %v1347_v36 = vpop.permute.xlu0 %1346 }
 0x4b0   : > { %v1407_v10 = vadd.f32 %v1406_v18, %v1339_v17 }
 0x4b2   : > { %v1408_v12 = vadd.f32 %v1407_v10, %v1341_v20 }
 0x4b4   : > { %v1409_v14 = vadd.f32 %v1408_v12, %v1343_v0 }
 0x4b7   : > { %v1345_v30 = vpop.permute.xlu2 %1344 }
 0x4b8   : > { %v1410_v15 = vadd.f32 %v1409_v14, %v1345_v30 }
 0x4ba   : > { %v1411_v19 = vadd.f32 %v1410_v15, %v1347_v36 }
 0x4f2   : > { %v1349_v16 = vpop.permute.xlu1 %1348 }
 0x4f3   : > { %v1412_v8 = vadd.f32 %v1411_v19, %v1349_v16 }
 0x4f5   : > { %v1413_v11 = vrot.slane %v1412_v8, 4 }
 0x4f7   : > { %v1414_v62 = vadd.f32 %v1413_v11, %v1412_v8 }
 0x4f9   : > { %v1415_v7 = vrot.slane %v1414_v62, 2 }
 0x4fb   : > { %v1416_v56 = vadd.f32 %v1415_v7, %v1414_v62 }
 0x4fd   : > { %v1417_v59 = vrot.slane %v1416_v56, 1 }
 0x4ff   : > { %v1418_v50 = vadd.f32 %v1417_v59, %v1416_v56 }
 0x501   : > { %v1419_v1 = vmul.f32 0.03125, %v1418_v50 }
 0x503   : > { %1420 = vst [vmem:[%s267_s13] sm:$0x1] %v1419_v1 }
 0x504 PF: > { %s16_s21 = sadd.s32 1, %s1548_s21  }
 0x505   : > { %p13_p4 = scmp.ge.s32.totalorder %s16_s21, 4  }
 0x507   :  { %15 = sbr.rel (!%p13_p4) target bundleno = 1 (0x1), region = 77 }

</bundles_post_ra>
